<compile_context>
chip_gen: v5e
topology: v5e:2x2
jax: 0.10.0
libtpu: 0.0.40
codegen_flags: <defaults>
</compile_context>

<pallas_src>
import math

import jax
import jax.numpy as jnp
from jax.experimental import pallas as pl
from jax.experimental.pallas import tpu as pltpu

NEG_SLOPE = 0.01   # nn.LeakyReLU() default negative_slope
L_SEQ = 13         # fc1 expects 64 * 13 features -> input length must be 13
C1, C2, H1, NOUT = 32, 64, 128, 4


def _leaky(v):
    return jnp.where(v > 0, v, NEG_SLOPE * v)


def _round_up(a, m):
    return ((a + m - 1) // m) * m


def cnn_kernel(xcol_ref, w1t_ref, b1_ref, w1x1t_ref, bmid_ref, w2t_ref,
               wfc1_ref, bfc1_ref, wfc2t_ref, bfc2_ref, out_ref,
               pad_ref, fc1in_ref):
    """One batch tile.  Activation rows are ordered (l, b): row = l*B + b."""
    B = out_ref.shape[0]                 # batch tile (multiple of 8)
    L = L_SEQ
    M = L * B                            # rows per activation slab

    x = xcol_ref[...]                    # (M, 3)  im2col of the padded 1-ch input
    w1t = w1t_ref[...]                   # (3, 32)

    # conv1: Conv1d(1, 32, k=3, pad=1) + LeakyReLU -> (M, 32)
    out1 = b1_ref[...]                   # (1,32), broadcast happens once on first add
    for k in range(3):
        out1 = out1 + x[:, k:k + 1] * w1t[k:k + 1, :]
    out1 = _leaky(out1)

    w2t = w2t_ref[...]                   # (3, 32, 64)

    # conv1x1 (32->64) + conv2 center tap + combined (b1x1 + b2) bias -> (M, 64)
    acc = (jnp.dot(out1, w1x1t_ref[...], preferred_element_type=jnp.float32)
           + jnp.dot(out1, w2t[1], preferred_element_type=jnp.float32)
           + bmid_ref[...])

    # conv2 side taps: zero-padded scratch with one extra "position" (B rows)
    # on each side; shifted windows are aligned slices (no concatenate).
    zero_blk = jnp.zeros((B, C1), jnp.float32)
    pad_ref[0:B, :] = zero_blk
    pad_ref[(L + 1) * B:(L + 2) * B, :] = zero_blk
    pad_ref[B:(L + 1) * B, :] = out1
    acc = acc + jnp.dot(pad_ref[0:M, :], w2t[0],
                        preferred_element_type=jnp.float32)
    acc = acc + jnp.dot(pad_ref[2 * B:(L + 2) * B, :], w2t[2],
                        preferred_element_type=jnp.float32)
    out2 = _leaky(acc)                   # (M, 64) == out_conv2[b, c, l] at row l*B+b

    # fc1: assemble (B, 13*64) (feature index l*64 + c, matching the
    # pre-permuted weights), then a single (B,832)x(832,128) matmul.
    for l in range(L):
        fc1in_ref[:, l * C2:(l + 1) * C2] = out2[l * B:(l + 1) * B, :]
    h = _leaky(jnp.dot(fc1in_ref[...], wfc1_ref[...],
                       preferred_element_type=jnp.float32) + bfc1_ref[...])
    # TODO(synk): nn.Dropout is stochastic in train mode; treated as identity (eval).

    # fc2: Linear(128, 4) for the whole tile, one bulk store.
    out_ref[...] = (jnp.dot(h, wfc2t_ref[...], preferred_element_type=jnp.float32)
                    + bfc2_ref[...])


def cnn_forward(x, params, *, block_b=128):
    """x: (B, 1, 13) float32 (PyTorch NCW).  Returns (B, 4) float32 (eval mode)."""
    w1, b1, w1x1, b1x1, w2, b2, wfc1, bfc1, wfc2, bfc2 = params
    B, cin, L = x.shape
    assert cin == 1 and L == L_SEQ
    assert block_b % 8 == 0

    # ---- batch tiling ----
    bt = min(block_b, _round_up(B, 8))       # batch tile, multiple of 8
    bp = _round_up(B, bt)                    # padded batch
    nt = bp // bt                            # grid size
    m_blk = L * bt                           # activation rows per tile

    # ---- glue: data/param re-arrangement (pure indexing, no compute) ----
    xsig = jnp.pad(x[:, 0, :].astype(jnp.float32), ((0, bp - B), (0, 0)))   # (bp, 13)
    xpad = jnp.pad(xsig, ((0, 0), (1, 1)))                                  # (bp, 15)
    xcol = jnp.stack([xpad[:, k:k + L] for k in range(3)], axis=-1)         # (bp, 13, 3)
    # tile-major, then position-major / batch-minor inside each tile
    xcol_t = (xcol.reshape(nt, bt, L, 3)
                  .transpose(0, 2, 1, 3)
                  .reshape(nt * m_blk, 3))

    w1t = w1[:, 0, :].T                                  # (3, 32)
    w1x1t = w1x1[:, :, 0].T                              # (32, 64)
    w2t = jnp.transpose(w2, (2, 1, 0))                   # (3, 32, 64)
    # PyTorch flatten is channel-major (feature = c*13 + l); permute so the
    # kernel's (l, c) flatten uses one pre-flattened (832, 128) weight.
    wfc1_flat = jnp.transpose(wfc1.reshape(H1, C2, L), (2, 1, 0)).reshape(L * C2, H1)
    wfc2t = wfc2.T                                       # (128, 4)
    bmid = (b1x1 + b2).reshape(1, C2)                    # conv1x1 + conv2 biases

    args = (xcol_t, w1t, b1.reshape(1, C1), w1x1t, bmid, w2t,
            wfc1_flat, bfc1.reshape(1, H1), wfc2t, bfc2.reshape(1, NOUT))

    def resident(a):   # whole array, VMEM-resident across the batch grid
        if a.ndim == 2:
            return pl.BlockSpec(a.shape, lambda i: (0, 0))
        return pl.BlockSpec(a.shape, lambda i: (0, 0, 0))

    out = pl.pallas_call(
        cnn_kernel,
        out_shape=jax.ShapeDtypeStruct((bp, NOUT), jnp.float32),
        grid=(nt,),
        in_specs=[pl.BlockSpec((m_blk, 3), lambda i: (i, 0))]
                 + [resident(a) for a in args[1:]],
        out_specs=pl.BlockSpec((bt, NOUT), lambda i: (i, 0)),
        scratch_shapes=[pltpu.VMEM(((L + 2) * bt, C1), jnp.float32),   # padded out1
                        pltpu.VMEM((bt, L * C2), jnp.float32)],        # fc1 input slab
        compiler_params=pltpu.CompilerParams(
            dimension_semantics=("parallel",)),
    )(*args)
    return out[:B]


def torch_reference(x, params):
    """Pure-JAX re-implementation of the PyTorch forward (eval mode)."""
    w1, b1, w1x1, b1x1, w2, b2, wfc1, bfc1, wfc2, bfc2 = params
    dn = ('NCH', 'OIH', 'NCH')

    def conv1d(a, w, bias, pad):
        y = jax.lax.conv_general_dilated(a, w, (1,), [(pad, pad)],
                                         dimension_numbers=dn)
        return y + bias[None, :, None]

    o1 = _leaky(conv1d(x, w1, b1, 1))
    m = conv1d(o1, w1x1, b1x1, 0)
    o2 = _leaky(conv1d(o1, w2, b2, 1) + m)
    flat = o2.reshape(o2.shape[0], -1)
    h = _leaky(flat @ wfc1.T + bfc1)
    return h @ wfc2.T + bfc2


def init_params(key):
    def uinit(k, shape, fan_in):
        bound = 1.0 / math.sqrt(fan_in)
        return jax.random.uniform(k, shape, jnp.float32, -bound, bound)

    ks = jax.random.split(key, 10)
    w1 = uinit(ks[0], (32, 1, 3), 3)
    b1 = uinit(ks[1], (32,), 3)
    w1x1 = uinit(ks[2], (64, 32, 1), 32)
    b1x1 = uinit(ks[3], (64,), 32)
    w2 = uinit(ks[4], (64, 32, 3), 32 * 3)
    b2 = uinit(ks[5], (64,), 32 * 3)
    wfc1 = uinit(ks[6], (128, 64 * L_SEQ), 64 * L_SEQ)
    bfc1 = uinit(ks[7], (128,), 64 * L_SEQ)
    wfc2 = uinit(ks[8], (4, 128), 128)
    bfc2 = uinit(ks[9], (4,), 128)
    return (w1, b1, w1x1, b1x1, w2, b2, wfc1, bfc1, wfc2, bfc2)


if __name__ == "__main__":
    root = jax.random.PRNGKey(0)
    pkey, xkey = jax.random.split(root)
    params = init_params(pkey)

    # primary check: small batch, same shapes as the PyTorch module expects
    x = jax.random.normal(xkey, (2, 1, L_SEQ), jnp.float32)     # (B=2, C=1, L=13)
    out = jax.block_until_ready(cnn_forward(x, params))
    ref = torch_reference(x, params)
    assert out.shape == (2, 4)
    assert jnp.allclose(out, ref, rtol=1e-4, atol=1e-4), (out, ref)

    # secondary check: batch that exercises the batch-padding path
    x2 = jax.random.normal(jax.random.PRNGKey(7), (11, 1, L_SEQ), jnp.float32)
    out2 = jax.block_until_ready(cnn_forward(x2, params))
    ref2 = torch_reference(x2, params)
    assert out2.shape == (11, 4)
    assert jnp.allclose(out2, ref2, rtol=1e-4, atol=1e-4), (out2, ref2)

    print("KERNEL_OK")
</pallas_src>

<mosaic_0001>
module attributes {stable_mosaic.version = 11 : i64} {
  func.func @cnn_kernel(%arg0: i32, %arg1: memref<104x3xf32, #tpu.memory_space<vmem>>, %arg2: memref<3x32xf32, #tpu.memory_space<vmem>>, %arg3: memref<1x32xf32, #tpu.memory_space<vmem>>, %arg4: memref<32x64xf32, #tpu.memory_space<vmem>>, %arg5: memref<1x64xf32, #tpu.memory_space<vmem>>, %arg6: memref<3x32x64xf32, #tpu.memory_space<vmem>>, %arg7: memref<832x128xf32, #tpu.memory_space<vmem>>, %arg8: memref<1x128xf32, #tpu.memory_space<vmem>>, %arg9: memref<128x4xf32, #tpu.memory_space<vmem>>, %arg10: memref<1x4xf32, #tpu.memory_space<vmem>>, %arg11: memref<8x4xf32, #tpu.memory_space<vmem>>, %arg12: memref<120x32xf32, #tpu.memory_space<vmem>>, %arg13: memref<8x832xf32, #tpu.memory_space<vmem>>) attributes {dimension_semantics = [#tpu.dimension_semantics<parallel>], iteration_bounds = array<i64: 1>, scalar_prefetch = 0 : i64, scratch_operands = 2 : i64, tpu.core_type = #tpu.core_type<tc>, window_params = [{transform_indices = @transform_0, window_bounds = array<i64: 104, 3>}, {pipeline_mode = #tpu.pipeline_mode<synchronous>, transform_indices = @transform_1, window_bounds = array<i64: 3, 32>}, {pipeline_mode = #tpu.pipeline_mode<synchronous>, transform_indices = @transform_2, window_bounds = array<i64: 1, 32>}, {pipeline_mode = #tpu.pipeline_mode<synchronous>, transform_indices = @transform_3, window_bounds = array<i64: 32, 64>}, {pipeline_mode = #tpu.pipeline_mode<synchronous>, transform_indices = @transform_4, window_bounds = array<i64: 1, 64>}, {pipeline_mode = #tpu.pipeline_mode<synchronous>, transform_indices = @transform_5, window_bounds = array<i64: 3, 32, 64>}, {pipeline_mode = #tpu.pipeline_mode<synchronous>, transform_indices = @transform_6, window_bounds = array<i64: 832, 128>}, {pipeline_mode = #tpu.pipeline_mode<synchronous>, transform_indices = @transform_7, window_bounds = array<i64: 1, 128>}, {pipeline_mode = #tpu.pipeline_mode<synchronous>, transform_indices = @transform_8, window_bounds = array<i64: 128, 4>}, {pipeline_mode = #tpu.pipeline_mode<synchronous>, transform_indices = @transform_9, window_bounds = array<i64: 1, 4>}, {transform_indices = @transform_10, window_bounds = array<i64: 8, 4>}]} {
    %c0 = arith.constant 0 : index
    %c0_0 = arith.constant 0 : index
    %0 = vector.load %arg1[%c0, %c0_0] : memref<104x3xf32, #tpu.memory_space<vmem>>, vector<104x3xf32>
    %c0_1 = arith.constant 0 : index
    %c0_2 = arith.constant 0 : index
    %1 = vector.load %arg2[%c0_1, %c0_2] : memref<3x32xf32, #tpu.memory_space<vmem>>, vector<3x32xf32>
    %c0_3 = arith.constant 0 : index
    %c0_4 = arith.constant 0 : index
    %2 = vector.load %arg3[%c0_3, %c0_4] : memref<1x32xf32, #tpu.memory_space<vmem>>, vector<1x32xf32>
    %3 = vector.extract_strided_slice %0 {offsets = [0, 0], sizes = [104, 1], strides = [1, 1]} : vector<104x3xf32> to vector<104x1xf32>
    %4 = vector.extract_strided_slice %1 {offsets = [0, 0], sizes = [1, 32], strides = [1, 1]} : vector<3x32xf32> to vector<1x32xf32>
    %5 = vector.broadcast %3 : vector<104x1xf32> to vector<104x32xf32>
    %6 = vector.broadcast %4 : vector<1x32xf32> to vector<104x32xf32>
    %7 = arith.mulf %5, %6 : vector<104x32xf32>
    %8 = vector.broadcast %2 : vector<1x32xf32> to vector<104x32xf32>
    %9 = arith.addf %8, %7 : vector<104x32xf32>
    %10 = vector.extract_strided_slice %0 {offsets = [0, 1], sizes = [104, 1], strides = [1, 1]} : vector<104x3xf32> to vector<104x1xf32>
    %11 = vector.extract_strided_slice %1 {offsets = [1, 0], sizes = [1, 32], strides = [1, 1]} : vector<3x32xf32> to vector<1x32xf32>
    %12 = vector.broadcast %10 : vector<104x1xf32> to vector<104x32xf32>
    %13 = vector.broadcast %11 : vector<1x32xf32> to vector<104x32xf32>
    %14 = arith.mulf %12, %13 : vector<104x32xf32>
    %15 = arith.addf %9, %14 : vector<104x32xf32>
    %16 = vector.extract_strided_slice %0 {offsets = [0, 2], sizes = [104, 1], strides = [1, 1]} : vector<104x3xf32> to vector<104x1xf32>
    %17 = vector.extract_strided_slice %1 {offsets = [2, 0], sizes = [1, 32], strides = [1, 1]} : vector<3x32xf32> to vector<1x32xf32>
    %18 = vector.broadcast %16 : vector<104x1xf32> to vector<104x32xf32>
    %19 = vector.broadcast %17 : vector<1x32xf32> to vector<104x32xf32>
    %20 = arith.mulf %18, %19 : vector<104x32xf32>
    %21 = arith.addf %15, %20 : vector<104x32xf32>
    %cst = arith.constant 0.000000e+00 : f32
    %22 = vector.broadcast %cst : f32 to vector<104x32xf32>
    %23 = arith.cmpf ogt, %21, %22 : vector<104x32xf32>
    %cst_5 = arith.constant 0.00999999977 : f32
    %24 = vector.broadcast %cst_5 : f32 to vector<104x32xf32>
    %25 = arith.mulf %24, %21 : vector<104x32xf32>
    %26 = arith.select %23, %21, %25 : vector<104x32xi1>, vector<104x32xf32>
    %c0_6 = arith.constant 0 : index
    %c0_7 = arith.constant 0 : index
    %c0_8 = arith.constant 0 : index
    %27 = vector.load %arg6[%c0_6, %c0_7, %c0_8] : memref<3x32x64xf32, #tpu.memory_space<vmem>>, vector<3x32x64xf32>
    %c0_9 = arith.constant 0 : index
    %c0_10 = arith.constant 0 : index
    %28 = vector.load %arg4[%c0_9, %c0_10] : memref<32x64xf32, #tpu.memory_space<vmem>>, vector<32x64xf32>
    %cst_11 = arith.constant dense<0.000000e+00> : vector<104x64xf32>
    %29 = tpu.matmul %26, %28, %cst_11 {dimension_numbers = #tpu.dot_dimension_numbers<[1], [0], [0], [1], [0, 0, 1, 1], [], []>} : vector<104x32xf32>, vector<32x64xf32>, vector<104x64xf32> -> vector<104x64xf32>
    %30 = vector.extract_strided_slice %27 {offsets = [1, 0, 0], sizes = [1, 32, 64], strides = [1, 1, 1]} : vector<3x32x64xf32> to vector<1x32x64xf32>
    %31 = vector.shape_cast %30 : vector<1x32x64xf32> to vector<32x64xf32>
    %cst_12 = arith.constant dense<0.000000e+00> : vector<104x64xf32>
    %32 = tpu.matmul %26, %31, %cst_12 {dimension_numbers = #tpu.dot_dimension_numbers<[1], [0], [0], [1], [0, 0, 1, 1], [], []>} : vector<104x32xf32>, vector<32x64xf32>, vector<104x64xf32> -> vector<104x64xf32>
    %33 = arith.addf %29, %32 : vector<104x64xf32>
    %c0_13 = arith.constant 0 : index
    %c0_14 = arith.constant 0 : index
    %34 = vector.load %arg5[%c0_13, %c0_14] : memref<1x64xf32, #tpu.memory_space<vmem>>, vector<1x64xf32>
    %35 = vector.broadcast %34 : vector<1x64xf32> to vector<104x64xf32>
    %36 = arith.addf %33, %35 : vector<104x64xf32>
    %cst_15 = arith.constant 0.000000e+00 : f32
    %37 = vector.broadcast %cst_15 : f32 to vector<8x32xf32>
    %c0_16 = arith.constant 0 : index
    %c0_17 = arith.constant 0 : index
    %38 = vector.load %arg12[%c0_16, %c0_17] : memref<120x32xf32, #tpu.memory_space<vmem>>, vector<8x32xf32>
    tpu.vector_store %arg12[%c0_16, %c0_17], %37 {strides = array<i32>} : memref<120x32xf32, #tpu.memory_space<vmem>>, vector<8x32xf32>,
    %c112 = arith.constant 112 : index
    %c0_18 = arith.constant 0 : index
    %39 = vector.load %arg12[%c112, %c0_18] : memref<120x32xf32, #tpu.memory_space<vmem>>, vector<8x32xf32>
    tpu.vector_store %arg12[%c112, %c0_18], %37 {strides = array<i32>} : memref<120x32xf32, #tpu.memory_space<vmem>>, vector<8x32xf32>,
    %c8 = arith.constant 8 : index
    %c0_19 = arith.constant 0 : index
    %40 = vector.load %arg12[%c8, %c0_19] : memref<120x32xf32, #tpu.memory_space<vmem>>, vector<104x32xf32>
    tpu.vector_store %arg12[%c8, %c0_19], %26 {strides = array<i32>} : memref<120x32xf32, #tpu.memory_space<vmem>>, vector<104x32xf32>,
    %c0_20 = arith.constant 0 : index
    %c0_21 = arith.constant 0 : index
    %41 = vector.load %arg12[%c0_20, %c0_21] : memref<120x32xf32, #tpu.memory_space<vmem>>, vector<104x32xf32>
    %42 = vector.extract_strided_slice %27 {offsets = [0, 0, 0], sizes = [1, 32, 64], strides = [1, 1, 1]} : vector<3x32x64xf32> to vector<1x32x64xf32>
    %43 = vector.shape_cast %42 : vector<1x32x64xf32> to vector<32x64xf32>
    %cst_22 = arith.constant dense<0.000000e+00> : vector<104x64xf32>
    %44 = tpu.matmul %41, %43, %cst_22 {dimension_numbers = #tpu.dot_dimension_numbers<[1], [0], [0], [1], [0, 0, 1, 1], [], []>} : vector<104x32xf32>, vector<32x64xf32>, vector<104x64xf32> -> vector<104x64xf32>
    %45 = arith.addf %36, %44 : vector<104x64xf32>
    %c16 = arith.constant 16 : index
    %c0_23 = arith.constant 0 : index
    %46 = vector.load %arg12[%c16, %c0_23] : memref<120x32xf32, #tpu.memory_space<vmem>>, vector<104x32xf32>
    %47 = vector.extract_strided_slice %27 {offsets = [2, 0, 0], sizes = [1, 32, 64], strides = [1, 1, 1]} : vector<3x32x64xf32> to vector<1x32x64xf32>
    %48 = vector.shape_cast %47 : vector<1x32x64xf32> to vector<32x64xf32>
    %cst_24 = arith.constant dense<0.000000e+00> : vector<104x64xf32>
    %49 = tpu.matmul %46, %48, %cst_24 {dimension_numbers = #tpu.dot_dimension_numbers<[1], [0], [0], [1], [0, 0, 1, 1], [], []>} : vector<104x32xf32>, vector<32x64xf32>, vector<104x64xf32> -> vector<104x64xf32>
    %50 = arith.addf %45, %49 : vector<104x64xf32>
    %cst_25 = arith.constant 0.000000e+00 : f32
    %51 = vector.broadcast %cst_25 : f32 to vector<104x64xf32>
    %52 = arith.cmpf ogt, %50, %51 : vector<104x64xf32>
    %cst_26 = arith.constant 0.00999999977 : f32
    %53 = vector.broadcast %cst_26 : f32 to vector<104x64xf32>
    %54 = arith.mulf %53, %50 : vector<104x64xf32>
    %55 = arith.select %52, %50, %54 : vector<104x64xi1>, vector<104x64xf32>
    %56 = vector.extract_strided_slice %55 {offsets = [0, 0], sizes = [8, 64], strides = [1, 1]} : vector<104x64xf32> to vector<8x64xf32>
    %c0_27 = arith.constant 0 : index
    %c0_28 = arith.constant 0 : index
    %57 = vector.load %arg13[%c0_27, %c0_28] : memref<8x832xf32, #tpu.memory_space<vmem>>, vector<8x64xf32>
    tpu.vector_store %arg13[%c0_27, %c0_28], %56 {strides = array<i32>} : memref<8x832xf32, #tpu.memory_space<vmem>>, vector<8x64xf32>,
    %58 = vector.extract_strided_slice %55 {offsets = [8, 0], sizes = [8, 64], strides = [1, 1]} : vector<104x64xf32> to vector<8x64xf32>
    %c0_29 = arith.constant 0 : index
    %c64 = arith.constant 64 : index
    %59 = vector.load %arg13[%c0_29, %c64] : memref<8x832xf32, #tpu.memory_space<vmem>>, vector<8x64xf32>
    tpu.vector_store %arg13[%c0_29, %c64], %58 {strides = array<i32>} : memref<8x832xf32, #tpu.memory_space<vmem>>, vector<8x64xf32>,
    %60 = vector.extract_strided_slice %55 {offsets = [16, 0], sizes = [8, 64], strides = [1, 1]} : vector<104x64xf32> to vector<8x64xf32>
    %c0_30 = arith.constant 0 : index
    %c128 = arith.constant 128 : index
    %61 = vector.load %arg13[%c0_30, %c128] : memref<8x832xf32, #tpu.memory_space<vmem>>, vector<8x64xf32>
    tpu.vector_store %arg13[%c0_30, %c128], %60 {strides = array<i32>} : memref<8x832xf32, #tpu.memory_space<vmem>>, vector<8x64xf32>,
    %62 = vector.extract_strided_slice %55 {offsets = [24, 0], sizes = [8, 64], strides = [1, 1]} : vector<104x64xf32> to vector<8x64xf32>
    %c0_31 = arith.constant 0 : index
    %c192 = arith.constant 192 : index
    %63 = vector.load %arg13[%c0_31, %c192] : memref<8x832xf32, #tpu.memory_space<vmem>>, vector<8x64xf32>
    tpu.vector_store %arg13[%c0_31, %c192], %62 {strides = array<i32>} : memref<8x832xf32, #tpu.memory_space<vmem>>, vector<8x64xf32>,
    %64 = vector.extract_strided_slice %55 {offsets = [32, 0], sizes = [8, 64], strides = [1, 1]} : vector<104x64xf32> to vector<8x64xf32>
    %c0_32 = arith.constant 0 : index
    %c256 = arith.constant 256 : index
    %65 = vector.load %arg13[%c0_32, %c256] : memref<8x832xf32, #tpu.memory_space<vmem>>, vector<8x64xf32>
    tpu.vector_store %arg13[%c0_32, %c256], %64 {strides = array<i32>} : memref<8x832xf32, #tpu.memory_space<vmem>>, vector<8x64xf32>,
    %66 = vector.extract_strided_slice %55 {offsets = [40, 0], sizes = [8, 64], strides = [1, 1]} : vector<104x64xf32> to vector<8x64xf32>
    %c0_33 = arith.constant 0 : index
    %c320 = arith.constant 320 : index
    %67 = vector.load %arg13[%c0_33, %c320] : memref<8x832xf32, #tpu.memory_space<vmem>>, vector<8x64xf32>
    tpu.vector_store %arg13[%c0_33, %c320], %66 {strides = array<i32>} : memref<8x832xf32, #tpu.memory_space<vmem>>, vector<8x64xf32>,
    %68 = vector.extract_strided_slice %55 {offsets = [48, 0], sizes = [8, 64], strides = [1, 1]} : vector<104x64xf32> to vector<8x64xf32>
    %c0_34 = arith.constant 0 : index
    %c384 = arith.constant 384 : index
    %69 = vector.load %arg13[%c0_34, %c384] : memref<8x832xf32, #tpu.memory_space<vmem>>, vector<8x64xf32>
    tpu.vector_store %arg13[%c0_34, %c384], %68 {strides = array<i32>} : memref<8x832xf32, #tpu.memory_space<vmem>>, vector<8x64xf32>,
    %70 = vector.extract_strided_slice %55 {offsets = [56, 0], sizes = [8, 64], strides = [1, 1]} : vector<104x64xf32> to vector<8x64xf32>
    %c0_35 = arith.constant 0 : index
    %c448 = arith.constant 448 : index
    %71 = vector.load %arg13[%c0_35, %c448] : memref<8x832xf32, #tpu.memory_space<vmem>>, vector<8x64xf32>
    tpu.vector_store %arg13[%c0_35, %c448], %70 {strides = array<i32>} : memref<8x832xf32, #tpu.memory_space<vmem>>, vector<8x64xf32>,
    %72 = vector.extract_strided_slice %55 {offsets = [64, 0], sizes = [8, 64], strides = [1, 1]} : vector<104x64xf32> to vector<8x64xf32>
    %c0_36 = arith.constant 0 : index
    %c512 = arith.constant 512 : index
    %73 = vector.load %arg13[%c0_36, %c512] : memref<8x832xf32, #tpu.memory_space<vmem>>, vector<8x64xf32>
    tpu.vector_store %arg13[%c0_36, %c512], %72 {strides = array<i32>} : memref<8x832xf32, #tpu.memory_space<vmem>>, vector<8x64xf32>,
    %74 = vector.extract_strided_slice %55 {offsets = [72, 0], sizes = [8, 64], strides = [1, 1]} : vector<104x64xf32> to vector<8x64xf32>
    %c0_37 = arith.constant 0 : index
    %c576 = arith.constant 576 : index
    %75 = vector.load %arg13[%c0_37, %c576] : memref<8x832xf32, #tpu.memory_space<vmem>>, vector<8x64xf32>
    tpu.vector_store %arg13[%c0_37, %c576], %74 {strides = array<i32>} : memref<8x832xf32, #tpu.memory_space<vmem>>, vector<8x64xf32>,
    %76 = vector.extract_strided_slice %55 {offsets = [80, 0], sizes = [8, 64], strides = [1, 1]} : vector<104x64xf32> to vector<8x64xf32>
    %c0_38 = arith.constant 0 : index
    %c640 = arith.constant 640 : index
    %77 = vector.load %arg13[%c0_38, %c640] : memref<8x832xf32, #tpu.memory_space<vmem>>, vector<8x64xf32>
    tpu.vector_store %arg13[%c0_38, %c640], %76 {strides = array<i32>} : memref<8x832xf32, #tpu.memory_space<vmem>>, vector<8x64xf32>,
    %78 = vector.extract_strided_slice %55 {offsets = [88, 0], sizes = [8, 64], strides = [1, 1]} : vector<104x64xf32> to vector<8x64xf32>
    %c0_39 = arith.constant 0 : index
    %c704 = arith.constant 704 : index
    %79 = vector.load %arg13[%c0_39, %c704] : memref<8x832xf32, #tpu.memory_space<vmem>>, vector<8x64xf32>
    tpu.vector_store %arg13[%c0_39, %c704], %78 {strides = array<i32>} : memref<8x832xf32, #tpu.memory_space<vmem>>, vector<8x64xf32>,
    %80 = vector.extract_strided_slice %55 {offsets = [96, 0], sizes = [8, 64], strides = [1, 1]} : vector<104x64xf32> to vector<8x64xf32>
    %c0_40 = arith.constant 0 : index
    %c768 = arith.constant 768 : index
    %81 = vector.load %arg13[%c0_40, %c768] : memref<8x832xf32, #tpu.memory_space<vmem>>, vector<8x64xf32>
    tpu.vector_store %arg13[%c0_40, %c768], %80 {strides = array<i32>} : memref<8x832xf32, #tpu.memory_space<vmem>>, vector<8x64xf32>,
    %c0_41 = arith.constant 0 : index
    %c0_42 = arith.constant 0 : index
    %82 = vector.load %arg13[%c0_41, %c0_42] : memref<8x832xf32, #tpu.memory_space<vmem>>, vector<8x832xf32>
    %c0_43 = arith.constant 0 : index
    %c0_44 = arith.constant 0 : index
    %83 = vector.load %arg7[%c0_43, %c0_44] : memref<832x128xf32, #tpu.memory_space<vmem>>, vector<832x128xf32>
    %cst_45 = arith.constant dense<0.000000e+00> : vector<8x128xf32>
    %84 = tpu.matmul %82, %83, %cst_45 {dimension_numbers = #tpu.dot_dimension_numbers<[1], [0], [0], [1], [0, 0, 1, 1], [], []>} : vector<8x832xf32>, vector<832x128xf32>, vector<8x128xf32> -> vector<8x128xf32>
    %c0_46 = arith.constant 0 : index
    %c0_47 = arith.constant 0 : index
    %85 = vector.load %arg8[%c0_46, %c0_47] : memref<1x128xf32, #tpu.memory_space<vmem>>, vector<1x128xf32>
    %86 = vector.broadcast %85 : vector<1x128xf32> to vector<8x128xf32>
    %87 = arith.addf %84, %86 : vector<8x128xf32>
    %cst_48 = arith.constant 0.000000e+00 : f32
    %88 = vector.broadcast %cst_48 : f32 to vector<8x128xf32>
    %89 = arith.cmpf ogt, %87, %88 : vector<8x128xf32>
    %cst_49 = arith.constant 0.00999999977 : f32
    %90 = vector.broadcast %cst_49 : f32 to vector<8x128xf32>
    %91 = arith.mulf %90, %87 : vector<8x128xf32>
    %92 = arith.select %89, %87, %91 : vector<8x128xi1>, vector<8x128xf32>
    %c0_50 = arith.constant 0 : index
    %c0_51 = arith.constant 0 : index
    %93 = vector.load %arg9[%c0_50, %c0_51] : memref<128x4xf32, #tpu.memory_space<vmem>>, vector<128x4xf32>
    %cst_52 = arith.constant dense<0.000000e+00> : vector<8x4xf32>
    %94 = tpu.matmul %92, %93, %cst_52 {dimension_numbers = #tpu.dot_dimension_numbers<[1], [0], [0], [1], [0, 0, 1, 1], [], []>} : vector<8x128xf32>, vector<128x4xf32>, vector<8x4xf32> -> vector<8x4xf32>
    %c0_53 = arith.constant 0 : index
    %c0_54 = arith.constant 0 : index
    %95 = vector.load %arg10[%c0_53, %c0_54] : memref<1x4xf32, #tpu.memory_space<vmem>>, vector<1x4xf32>
    %96 = vector.broadcast %95 : vector<1x4xf32> to vector<8x4xf32>
    %97 = arith.addf %94, %96 : vector<8x4xf32>
    %c0_55 = arith.constant 0 : index
    %c0_56 = arith.constant 0 : index
    %98 = vector.load %arg11[%c0_55, %c0_56] : memref<8x4xf32, #tpu.memory_space<vmem>>, vector<8x4xf32>
    tpu.vector_store %arg11[%c0_55, %c0_56], %97 {strides = array<i32>} : memref<8x4xf32, #tpu.memory_space<vmem>>, vector<8x4xf32>,
    return
  }
  func.func @transform_0(%arg0: i32) -> (i32, i32) {
    %c0_i32 = arith.constant 0 : i32
    %c0_i32_0 = arith.constant 0 : i32
    return %arg0, %c0_i32 : i32, i32
  }
  func.func @transform_1(%arg0: i32) -> (i32, i32) {
    %c0_i32 = arith.constant 0 : i32
    %c0_i32_0 = arith.constant 0 : i32
    %c0_i32_1 = arith.constant 0 : i32
    return %c0_i32, %c0_i32_0 : i32, i32
  }
  func.func @transform_2(%arg0: i32) -> (i32, i32) {
    %c0_i32 = arith.constant 0 : i32
    %c0_i32_0 = arith.constant 0 : i32
    %c0_i32_1 = arith.constant 0 : i32
    return %c0_i32, %c0_i32_0 : i32, i32
  }
  func.func @transform_3(%arg0: i32) -> (i32, i32) {
    %c0_i32 = arith.constant 0 : i32
    %c0_i32_0 = arith.constant 0 : i32
    %c0_i32_1 = arith.constant 0 : i32
    return %c0_i32, %c0_i32_0 : i32, i32
  }
  func.func @transform_4(%arg0: i32) -> (i32, i32) {
    %c0_i32 = arith.constant 0 : i32
    %c0_i32_0 = arith.constant 0 : i32
    %c0_i32_1 = arith.constant 0 : i32
    return %c0_i32, %c0_i32_0 : i32, i32
  }
  func.func @transform_5(%arg0: i32) -> (i32, i32, i32) {
    %c0_i32 = arith.constant 0 : i32
    %c0_i32_0 = arith.constant 0 : i32
    %c0_i32_1 = arith.constant 0 : i32
    %c0_i32_2 = arith.constant 0 : i32
    return %c0_i32, %c0_i32_0, %c0_i32_1 : i32, i32, i32
  }
  func.func @transform_6(%arg0: i32) -> (i32, i32) {
    %c0_i32 = arith.constant 0 : i32
    %c0_i32_0 = arith.constant 0 : i32
    %c0_i32_1 = arith.constant 0 : i32
    return %c0_i32, %c0_i32_0 : i32, i32
  }
  func.func @transform_7(%arg0: i32) -> (i32, i32) {
    %c0_i32 = arith.constant 0 : i32
    %c0_i32_0 = arith.constant 0 : i32
    %c0_i32_1 = arith.constant 0 : i32
    return %c0_i32, %c0_i32_0 : i32, i32
  }
  func.func @transform_8(%arg0: i32) -> (i32, i32) {
    %c0_i32 = arith.constant 0 : i32
    %c0_i32_0 = arith.constant 0 : i32
    %c0_i32_1 = arith.constant 0 : i32
    return %c0_i32, %c0_i32_0 : i32, i32
  }
  func.func @transform_9(%arg0: i32) -> (i32, i32) {
    %c0_i32 = arith.constant 0 : i32
    %c0_i32_0 = arith.constant 0 : i32
    %c0_i32_1 = arith.constant 0 : i32
    return %c0_i32, %c0_i32_0 : i32, i32
  }
  func.func @transform_10(%arg0: i32) -> (i32, i32) {
    %c0_i32 = arith.constant 0 : i32
    %c0_i32_0 = arith.constant 0 : i32
    return %arg0, %c0_i32 : i32, i32
  }
}

</mosaic_0001>

<bundles_post_ra>
// kernel: tpu_custom_call.1
= control target key start
LH: loop header
LB: loop body
LE: loop exit
PB: predicated region body
PF: predicated region fallthrough
CT: control target
= control target key end

     0   :  { %15 = vsyncpa [#allocation5], 0  ;;  %s1306_s16 = smov [#allocation4]   ;;  %s1307_s18 = smov 128   ;;  %s1724_s0 = inlined_call_operand.vmem [shape: f32[104,3], index: 0, kind: input, shape index: {}]   ;;  %s1725_s1 = inlined_call_operand.vmem [shape: f32[3,32], index: 1, kind: input, shape index: {}]   ;;  %s1726_s2 = inlined_call_operand.vmem [shape: f32[1,32], index: 2, kind: input, shape index: {}]   ;;  %s1727_s3 = inlined_call_operand.vmem [shape: f32[32,64], index: 3, kind: input, shape index: {}]   ;;  %s1728_s4 = inlined_call_operand.vmem [shape: f32[1,64], index: 4, kind: input, shape index: {}]   ;;  %s1729_s5 = inlined_call_operand.vmem [shape: f32[3,32,64], index: 5, kind: input, shape index: {}]   ;;  %s1730_s6 = inlined_call_operand.hbm [shape: f32[832,128], index: 6, kind: input, shape index: {}]   ;;  %s1731_s7 = inlined_call_operand.vmem [shape: f32[1,128], index: 7, kind: input, shape index: {}]   ;;  %s1732_s8 = inlined_call_operand.vmem [shape: f32[128,4], index: 8, kind: input, shape index: {}]   ;;  %s1733_s9 = inlined_call_operand.vmem [shape: f32[1,4], index: 9, kind: input, shape index: {}]   ;;  %s1734_s10 = inlined_call_operand.vmem [shape: f32[8,4], index: 10, kind: output, shape index: {}]  }
   0x1   :  { %s32_s15 = sshll.u32 %s1730_s6, 4  ;;  %s34_s17 = sshll.u32 %s1306_s16, 4  ;;  %s33_s15 = int_to_ptr.hbm [resolvable:$true] %s32_s15  ;;  %s35_s17 = int_to_ptr.vmem [resolvable:$true] %s34_s17 }
   0x2   :  { %s1308_s19 = smov 8  }
   0x3   :  { %40 = dma.hbm_to_vmem [thread:$0]  %s33_s15, 13312, %s35_s17, [#allocation5], %s1307_s18, %s1307_s18, %s1308_s19  }
   0x4   :  { %1304 = dma.done.wait [#allocation5], 13312  }
   0x5   :  { %1305 = vsyncadd [#allocation5], 4294953984  ;;  %v1309_v0 = vmov 2   ;;  %v1310_v1 = vmov 0   ;;  %v52_v2 = vld [vmem:[%s1724_s0 + $0x8] sm:$0xff]  ;;  %v53_v3 = vld [vmem:[%s1724_s0 + $0x10] sm:$0xff] }
   0x6   :  { %1249 = vset.pattern.permute.xlu1 %v1309_v0  ;;  %1247 = vset.pattern.permute.xlu0 %v1310_v1  ;;  %v51_v4 = vld [vmem:[%s1724_s0] sm:$0xff]  ;;  %v1311_v5 = vmov 1   ;;  %v54_v6 = vld [vmem:[%s1724_s0 + $0x18] sm:$0xff]  ;;  %v57_v8 = vld [vmem:[%s1724_s0 + $0x30] sm:$0xff]  ;;  %vm374_vm0 = vcmask 261120   ;;  %v1312_v16 = vmov 0.0  }
   0x7   :  { %1251 = vset.pattern.permute.xlu2 %v1310_v1  ;;  %245 = vperm.xlu1 %1249, %v52_v2   ;;  %v55_v7 = vld [vmem:[%s1724_s0 + $0x20] sm:$0xff]  ;;  %v58_v9 = vld [vmem:[%s1724_s0 + $0x38] sm:$0xff]  ;;  %v56_v10 = vld [vmem:[%s1724_s0 + $0x28] sm:$0xff]  ;;  %543 = vst.msk [vmem:[#allocation2] sm:$0xff] %vm374_vm0, %v1312_v16  ;;  %vm839_vm15 = vcmask 523264  }
   0x8   :  { %73 = vperm.xlu0 %1247, %v52_v2   ;;  %78 = vperm.xlu2 %1251, %v53_v3   ;;  %v60_v11 = vld [vmem:[%s1724_s0 + $0x48] sm:$0xff]  ;;  %v62_v12 = vld [vmem:[%s1724_s0 + $0x58] sm:$0xff]  ;;  %v59_v13 = vld [vmem:[%s1724_s0 + $0x40] sm:$0xff]  ;;  %544 = vst.msk [vmem:[#allocation2 + $0x70] sm:$0xff] %vm374_vm0, %v1312_v16 }
   0x9   :  { %v1433_v14 = vld [vmem:[%s1724_s0 + $0x60] sm:$0xff]  ;;  %v361_v15 = vld [vmem:[%s1729_s5 + $0x18] sm:$0xff]  ;;  %v360_v20 = vld [vmem:[%s1729_s5 + $0x10] sm:$0xff] }
   0xa   :  { %622 = vmatpush.msra.mxu2 %v361_v15  ;;  %v365_v18 = vld [vmem:[%s1729_s5 + $0x38] sm:$0xff]  ;;  %v61_v21 = vld [vmem:[%s1724_s0 + $0x50] sm:$0xff]  ;;  %v359_v24 = vld [vmem:[%s1729_s5 + $0x8] sm:$0xff] }
   0xb   :  { %v373_v19 = vld [vmem:[%s1727_s3 + $0x18] sm:$0xff]  ;;  %426 = vmatpush.msra.mxu0 %v365_v18  ;;  %v364_v22 = vld [vmem:[%s1729_s5 + $0x30] sm:$0xff]  ;;  %v363_v25 = vld [vmem:[%s1729_s5 + $0x28] sm:$0xff] }
   0xc   :  { %482 = vmatpush.msra.mxu1 %v373_v19  ;;  %623 = vmatpush.msra.mxu2 %v360_v20  ;;  %v372_v23 = vld [vmem:[%s1727_s3 + $0x10] sm:$0xff]  ;;  %v371_v26 = vld [vmem:[%s1727_s3 + $0x8] sm:$0xff]  ;;  %v358_v27 = vld [vmem:[%s1729_s5] sm:$0xff] }
   0xd   :  { %427 = vmatpush.msra.mxu0 %v364_v22  ;;  %v362_v29 = vld [vmem:[%s1729_s5 + $0x20] sm:$0xff]  ;;  %v369_v31 = vld [vmem:[%s1729_s5 + $0x58] sm:$0xff]  ;;  %v368_v32 = vld [vmem:[%s1729_s5 + $0x50] sm:$0xff] }
   0xe   :  { %483 = vmatpush.msra.mxu1 %v372_v23  ;;  %624 = vmatpush.msra.mxu2 %v359_v24  ;;  %v558_v28 = vld [vmem:[#allocation2] sm:$0xff]  ;;  %v367_v34 = vld [vmem:[%s1729_s5 + $0x48] sm:$0xff] }
   0xf   :  { %1250 = vset.pattern.permute.xlu1 %v1310_v1  ;;  %428 = vmatpush.msra.mxu0 %v363_v25  ;;  %v370_v30 = vld [vmem:[%s1727_s3] sm:$0xff] }
  0x10   :  { %1248 = vset.pattern.permute.xlu0 %v1311_v5  ;;  %68 = vperm.xlu1 %1250, %v51_v4   ;;  %v366_v35 = vld [vmem:[%s1729_s5 + $0x40] sm:$0xff] }
  0x11   :  { %166 = vperm.xlu0 %1248, %v52_v2   ;;  %1252 = vset.pattern.permute.xlu2 %v1311_v5  ;;  %v64_v38 = vld [vmem:[%s1725_s1] sm:$0x7] }
  0x12   :  { %162 = vperm.xlu2 %1252, %v51_v4   ;;  %484 = vmatpush.msra.mxu1 %v371_v26  ;;  %v1497_v40 = vperm.slane %v64_v38, 0  ;;  %v1503_v42 = vld [vmem:[%s1726_s2] ss:$0 sm:$0xff]  ;;  %v1505_v43 = vperm.slane %v64_v38, 1  ;;  %v1509_v44 = vperm.slane %v64_v38, 2 }
  0x13   :  { %625 = vmatpush.msra.mxu2 %v358_v27  ;;  %429 = vmatpush.msra.mxu0 %v362_v29 }
  0x14   :  { %1212 = vmatmul.msk.f32.vlgmr.msra.gmra.mxu2 %vm374_vm0, %v558_v28  ;;  %485 = vmatpush.msra.mxu1 %v370_v30 }
  0x15   :  { %743 = vmatpush.msra.mxu3 %v369_v31 }
  0x17   :  { %744 = vmatpush.msra.mxu3 %v368_v32 }
  0x18   :  { %1253 = vset.pattern.permute.xlu1 %v1311_v5 }
  0x19   :  { %1255 = vset.pattern.permute.xlu0 %v1309_v0  ;;  %170 = vperm.xlu1 %1253, %v53_v3  }
  0x1a   :  { %249 = vperm.xlu0 %1255, %v53_v3   ;;  %1254 = vset.pattern.permute.xlu2 %v1309_v0 }
  0x1b   :  { %241 = vperm.xlu2 %1254, %v51_v4   ;;  %745 = vmatpush.msra.mxu3 %v367_v34 }
  0x1d   :  { %746 = vmatpush.msra.mxu3 %v366_v35 }
  0x21   :  { %1256 = vset.pattern.permute.xlu1 %v1310_v1 }
  0x22   :  { %1260 = vset.pattern.permute.xlu0 %v1311_v5  ;;  %83 = vperm.xlu1 %1256, %v54_v6  }
  0x23   :  { %178 = vperm.xlu0 %1260, %v55_v7   ;;  %1257 = vset.pattern.permute.xlu2 %v1311_v5 }
  0x24   :  { %174 = vperm.xlu2 %1257, %v54_v6  }
  0x2a   :  { %1258 = vset.pattern.permute.xlu1 %v1309_v0 }
  0x2b   :  { %1263 = vset.pattern.permute.xlu0 %v1310_v1  ;;  %253 = vperm.xlu1 %1258, %v54_v6  }
  0x2c   :  { %98 = vperm.xlu0 %1263, %v57_v8   ;;  %1259 = vset.pattern.permute.xlu2 %v1310_v1 }
  0x2d   :  { %88 = vperm.xlu2 %1259, %v55_v7  }
  0x33   :  { %257 = vperm.xlu1 %1258, %v55_v7  }
  0x34   :  { %1266 = vset.pattern.permute.xlu0 %v1309_v0 }
  0x35   :  { %269 = vperm.xlu0 %1266, %v58_v9   ;;  %93 = vperm.xlu2 %1259, %v56_v10  }
  0x3b   :  { %1261 = vset.pattern.permute.xlu1 %v1311_v5 }
  0x3c   :  { %182 = vperm.xlu1 %1261, %v56_v10  }
  0x3d   :  { %1269 = vset.pattern.permute.xlu0 %v1311_v5  ;;  %1262 = vset.pattern.permute.xlu2 %v1309_v0 }
  0x3e   :  { %261 = vperm.xlu2 %1262, %v56_v10   ;;  %198 = vperm.xlu0 %1269, %v60_v11  }
  0x44   :  { %186 = vperm.xlu1 %1261, %v57_v8  }
  0x46   :  { %265 = vperm.xlu2 %1262, %v57_v8   ;;  %1272 = vset.pattern.permute.xlu0 %v1310_v1 }
  0x47   :  { %123 = vperm.xlu0 %1272, %v62_v12  }
  0x4c   :  { %1264 = vset.pattern.permute.xlu1 %v1310_v1 }
  0x4d   :  { %103 = vperm.xlu1 %1264, %v58_v9  }
  0x4e   :  { %1265 = vset.pattern.permute.xlu2 %v1311_v5 }
  0x4f   :  { %190 = vperm.xlu2 %1265, %v58_v9   ;;  %1275 = vset.pattern.permute.xlu0 %v1309_v0 }
  0x50   :  { %289 = vperm.xlu0 %1275, %v1433_v14  }
  0x55   :  { %108 = vperm.xlu1 %1264, %v59_v13  }
  0x57   :  { %194 = vperm.xlu2 %1265, %v59_v13  }
  0x5d   :  { %1267 = vset.pattern.permute.xlu1 %v1309_v0 }
  0x5e   :  { %273 = vperm.xlu1 %1267, %v59_v13  }
  0x5f   :  { %1268 = vset.pattern.permute.xlu2 %v1310_v1 }
  0x60   :  { %113 = vperm.xlu2 %1268, %v60_v11  }
  0x62   :  { %v1441_v17 = vpop.permute.xlu2 %78 }
  0x63   :  { %v134_v58 = vmul.f32 %v1497_v40, %v1441_v17 }
  0x66   :  { %277 = vperm.xlu1 %1267, %v60_v11  }
  0x68   :  { %118 = vperm.xlu2 %1268, %v61_v21  }
  0x6c   :  { %v163_v33 = vpop.permute.xlu2 %162 }
  0x6d   :  { %v214_v48 = vmul.f32 %v1505_v43, %v163_v33 }
  0x6e   :  { %1270 = vset.pattern.permute.xlu1 %v1311_v5 }
  0x6f   :  { %202 = vperm.xlu1 %1270, %v61_v21  }
  0x70   :  { %1271 = vset.pattern.permute.xlu2 %v1309_v0 }
  0x71   :  { %281 = vperm.xlu2 %1271, %v61_v21  }
  0x75   :  { %v242_v39 = vpop.permute.xlu2 %241 }
  0x76   :  { %v293_v55 = vmul.f32 %v1509_v44, %v242_v39 }
  0x77   :  { %206 = vperm.xlu1 %1270, %v62_v12  }
  0x79   :  { %v246_v36 = vpop.permute.xlu1 %245  ;;  %285 = vperm.xlu2 %1271, %v62_v12  }
  0x7a   :  { %v74_v37 = vpop.permute.xlu0 %73  ;;  %v294_v52 = vmul.f32 %v1509_v44, %v246_v36 }
  0x7b   :  { %v133_v41 = vmul.f32 %v1497_v40, %v74_v37 }
  0x7d   :  { %v149_v45 = vadd.f32 %v1503_v42, %v133_v41 }
  0x7e   :  { %v175_v51 = vpop.permute.xlu2 %174 }
  0x7f   :  { %1273 = vset.pattern.permute.xlu1 %v1310_v1  ;;  %v150_v1 = vadd.f32 %v1503_v42, %v134_v58  ;;  %v217_v15 = vmul.f32 %v1505_v43, %v175_v51 }
  0x80   :  { %128 = vperm.xlu1 %1273, %v1433_v14  }
  0x81   :  { %1274 = vset.pattern.permute.xlu2 %v1311_v5 }
  0x82   :  { %v69_v47 = vpop.permute.xlu1 %68  ;;  %210 = vperm.xlu2 %1274, %v1433_v14  }
  0x83   :  { %v167_v46 = vpop.permute.xlu0 %166  ;;  %v132_v50 = vmul.f32 %v1497_v40, %v69_v47 }
  0x84   :  { %v215_v49 = vmul.f32 %v1505_v43, %v167_v46 }
  0x85   :  { %v148_v54 = vadd.f32 %v1503_v42, %v132_v50 }
  0x86   :  { %v228_v53 = vadd.f32 %v215_v49, %v149_v45 }
  0x87   :  { %v227_v57 = vadd.f32 %v214_v48, %v148_v54  ;;  %v89_v6 = vpop.permute.xlu2 %88 }
  0x88   :  { %v307_v56 = vadd.f32 %v294_v52, %v228_v53  ;;  %v136_v19 = vmul.f32 %v1497_v40, %v89_v6 }
  0x89   :  { %v306_v60 = vadd.f32 %v293_v55, %v227_v57 }
  0x8a   :  { %vm320_vm1 = vcmp.gt.f32.partialorder %v307_v56, 0.0  ;;  %v333_v59 = vmul.f32 0.01, %v307_v56  ;;  %v152_v24 = vadd.f32 %v1503_v42, %v136_v19 }
  0x8b   :  { %v171_v62 = vpop.permute.xlu1 %170  ;;  %vm319_vm2 = vcmp.gt.f32.partialorder %v306_v60, 0.0  ;;  %v332_v0 = vmul.f32 0.01, %v306_v60 }
  0x8c   :  { %v346_v61 = vsel %vm320_vm1, %v307_v56, %v333_v59  ;;  %v250_v63 = vpop.permute.xlu0 %249  ;;  %v216_v2 = vmul.f32 %v1505_v43, %v171_v62 }
  0x8d   :  { %546 = vst.msk [vmem:[#allocation2 + $0x10] sm:$0xff] %vm374_vm0, %v346_v61  ;;  %v295_v3 = vmul.f32 %v1509_v44, %v250_v63  ;;  %v345_v4 = vsel %vm319_vm2, %v306_v60, %v332_v0 }
  0x8e   :  { %v229_v5 = vadd.f32 %v216_v2, %v150_v1  ;;  %1186 = vmatmul.msk.f32.vlgmr.msra.gmra.mxu0 %vm374_vm0, %v345_v4  ;;  %545 = vst.msk [vmem:[#allocation2 + $0x8] sm:$0xff] %vm374_vm0, %v345_v4  ;;  %1199 = vmatmul.msk.f32.vlgmr.msra.gmra.mxu1 %vm374_vm0, %v345_v4 }
  0x8f   :  { %v94_v14 = vpop.permute.xlu2 %93 }
  0x90   :  { %v308_v7 = vadd.f32 %v295_v3, %v229_v5  ;;  %v137_v34 = vmul.f32 %v1497_v40, %v94_v14 }
  0x92   :  { %vm321_vm3 = vcmp.gt.f32.partialorder %v308_v7, 0.0  ;;  %v334_v8 = vmul.f32 0.01, %v308_v7  ;;  %v153_v41 = vadd.f32 %v1503_v42, %v137_v34 }
  0x94   :  { %v679_v9 = vld [vmem:[#allocation2 + $0x10] sm:$0xff]  ;;  %v347_v10 = vsel %vm321_vm3, %v308_v7, %v334_v8  ;;  %v84_v11 = vpop.permute.xlu1 %83 }
  0x95   :  { %1225 = vmatmul.msk.f32.vlgmr.msra.gmra.mxu3 %vm374_vm0, %v679_v9  ;;  %547 = vst.msk [vmem:[#allocation2 + $0x18] sm:$0xff] %vm374_vm0, %v347_v10  ;;  %v559_v12 = vld [vmem:[#allocation2 + $0x8] sm:$0xff]  ;;  %v135_v13 = vmul.f32 %v1497_v40, %v84_v11  ;;  %v179_v22 = vpop.permute.xlu0 %178 }
  0x96   :  { %1187 = vmatmul.msk.f32.gmra.mxu0 %vm374_vm0, %v346_v61  ;;  %1200 = vmatmul.msk.f32.gmra.mxu1 %vm374_vm0, %v346_v61  ;;  %v218_v25 = vmul.f32 %v1505_v43, %v179_v22 }
  0x97   :  { %1213 = vmatmul.msk.f32.gmra.mxu2 %vm374_vm0, %v559_v12  ;;  %v151_v16 = vadd.f32 %v1503_v42, %v135_v13 }
  0x98   :  { %v262_v27 = vpop.permute.xlu2 %261  ;;  %v231_v30 = vadd.f32 %v218_v25, %v152_v24 }
  0x99   :  { %v230_v20 = vadd.f32 %v217_v15, %v151_v16  ;;  %v298_v45 = vmul.f32 %v1509_v44, %v262_v27 }
  0x9c   :  { %v680_v17 = vld [vmem:[#allocation2 + $0x18] sm:$0xff] }
  0x9d   :  { %1226 = vmatmul.msk.f32.gmra.mxu3 %vm374_vm0, %v680_v17  ;;  %v254_v18 = vpop.permute.xlu1 %253 }
  0x9e   :  { %v296_v21 = vmul.f32 %v1509_v44, %v254_v18  ;;  %1188 = vmatmul.msk.f32.gmra.mxu0 %vm374_vm0, %v347_v10  ;;  %1201 = vmatmul.msk.f32.gmra.mxu1 %vm374_vm0, %v347_v10  ;;  %v99_v39 = vpop.permute.xlu0 %98 }
  0x9f   :  { %1214 = vmatmul.msk.f32.gmra.mxu2 %vm374_vm0, %v679_v9  ;;  %v138_v48 = vmul.f32 %v1497_v40, %v99_v39 }
  0xa0   :  { %v309_v23 = vadd.f32 %v296_v21, %v230_v20  ;;  %v266_v37 = vpop.permute.xlu2 %265 }
  0xa1   :  { %v154_v51 = vadd.f32 %v1503_v42, %v138_v48  ;;  %v299_v57 = vmul.f32 %v1509_v44, %v266_v37 }
  0xa2   :  { %vm322_vm4 = vcmp.gt.f32.partialorder %v309_v23, 0.0  ;;  %v335_v26 = vmul.f32 0.01, %v309_v23 }
  0xa4   :  { %v348_v28 = vsel %vm322_vm4, %v309_v23, %v335_v26 }
  0xa5   :  { %v258_v29 = vpop.permute.xlu1 %257  ;;  %548 = vst.msk [vmem:[#allocation2 + $0x20] sm:$0xff] %vm374_vm0, %v348_v28 }
  0xa6   :  { %v297_v31 = vmul.f32 %v1509_v44, %v258_v29  ;;  %1189 = vmatmul.msk.f32.gmra.mxu0 %vm374_vm0, %v348_v28  ;;  %1202 = vmatmul.msk.f32.gmra.mxu1 %vm374_vm0, %v348_v28 }
  0xa7   :  { %1215 = vmatmul.msk.f32.gmra.mxu2 %vm374_vm0, %v680_v17  ;;  %v270_v0 = vpop.permute.xlu0 %269 }
  0xa8   :  { %v310_v32 = vadd.f32 %v297_v31, %v231_v30  ;;  %v300_v5 = vmul.f32 %v1509_v44, %v270_v0 }
  0xa9   :  { %v191_v54 = vpop.permute.xlu2 %190 }
  0xaa   :  { %vm323_vm5 = vcmp.gt.f32.partialorder %v310_v32, 0.0  ;;  %v336_v33 = vmul.f32 0.01, %v310_v32  ;;  %v221_v1 = vmul.f32 %v1505_v43, %v191_v54 }
  0xac   :  { %v681_v35 = vld [vmem:[#allocation2 + $0x20] sm:$0xff]  ;;  %v349_v36 = vsel %vm323_vm5, %v310_v32, %v336_v33 }
  0xad   :  { %1227 = vmatmul.msk.f32.gmra.mxu3 %vm374_vm0, %v681_v35  ;;  %549 = vst.msk [vmem:[#allocation2 + $0x28] sm:$0xff] %vm374_vm0, %v349_v36 }
  0xae   :  { %1190 = vmatmul.msk.f32.gmra.mxu0 %vm374_vm0, %v349_v36  ;;  %1203 = vmatmul.msk.f32.gmra.mxu1 %vm374_vm0, %v349_v36  ;;  %v183_v38 = vpop.permute.xlu1 %182 }
  0xaf   :  { %1216 = vmatmul.msk.f32.gmra.mxu2 %vm374_vm0, %v681_v35  ;;  %v219_v46 = vmul.f32 %v1505_v43, %v183_v38 }
  0xb0   :  { %v199_v21 = vpop.permute.xlu0 %198 }
  0xb1   :  { %v232_v47 = vadd.f32 %v219_v46, %v153_v41  ;;  %v195_v3 = vpop.permute.xlu2 %194  ;;  %v223_v25 = vmul.f32 %v1505_v43, %v199_v21 }
  0xb2   :  { %v222_v15 = vmul.f32 %v1505_v43, %v195_v3 }
  0xb3   :  { %v311_v49 = vadd.f32 %v298_v45, %v232_v47 }
  0xb4   :  { %v682_v50 = vld [vmem:[#allocation2 + $0x28] sm:$0xff] }
  0xb5   :  { %1228 = vmatmul.msk.f32.gmra.mxu3 %vm374_vm0, %v682_v50  ;;  %vm324_vm6 = vcmp.gt.f32.partialorder %v311_v49, 0.0  ;;  %v337_v52 = vmul.f32 0.01, %v311_v49 }
  0xb6   :  { %v187_v53 = vpop.permute.xlu1 %186 }
  0xb7   :  { %1217 = vmatmul.msk.f32.gmra.mxu2 %vm374_vm0, %v682_v50  ;;  %v220_v55 = vmul.f32 %v1505_v43, %v187_v53  ;;  %v350_v56 = vsel %vm324_vm6, %v311_v49, %v337_v52 }
  0xb8   :  { %1191 = vmatmul.msk.f32.gmra.mxu0 %vm374_vm0, %v350_v56  ;;  %550 = vst.msk [vmem:[#allocation2 + $0x30] sm:$0xff] %vm374_vm0, %v350_v56  ;;  %1204 = vmatmul.msk.f32.gmra.mxu1 %vm374_vm0, %v350_v56 }
  0xb9   :  { %v233_v58 = vadd.f32 %v220_v55, %v154_v51  ;;  %v124_v38 = vpop.permute.xlu0 %123 }
  0xba   :  { %v114_v12 = vpop.permute.xlu2 %113  ;;  %v143_v47 = vmul.f32 %v1497_v40, %v124_v38 }
  0xbb   :  { %v312_v59 = vadd.f32 %v299_v57, %v233_v58  ;;  %v141_v17 = vmul.f32 %v1497_v40, %v114_v12 }
  0xbc   :  { %v159_v51 = vadd.f32 %v1503_v42, %v143_v47 }
  0xbd   :  { %vm325_vm7 = vcmp.gt.f32.partialorder %v312_v59, 0.0  ;;  %v338_v60 = vmul.f32 0.01, %v312_v59  ;;  %v157_v24 = vadd.f32 %v1503_v42, %v141_v17 }
  0xbf   :  { %v104_v61 = vpop.permute.xlu1 %103  ;;  %v351_v62 = vsel %vm325_vm7, %v312_v59, %v338_v60  ;;  %v564_v63 = vld [vmem:[#allocation2 + $0x30] sm:$0xff]  ;;  %v236_v29 = vadd.f32 %v223_v25, %v157_v24 }
  0xc0   :  { %v139_v2 = vmul.f32 %v1497_v40, %v104_v61  ;;  %1192 = vmatmul.msk.f32.gmra.mxu0 %vm374_vm0, %v351_v62  ;;  %551 = vst.msk [vmem:[#allocation2 + $0x38] sm:$0xff] %vm374_vm0, %v351_v62  ;;  %1205 = vmatmul.msk.f32.gmra.mxu1 %vm374_vm0, %v351_v62 }
  0xc1   :  { %1218 = vmatmul.msk.f32.gmra.mxu2 %vm374_vm0, %v564_v63  ;;  %1229 = vmatmul.msk.f32.gmra.mxu3 %vm374_vm0, %v564_v63 }
  0xc2   :  { %v155_v4 = vadd.f32 %v1503_v42, %v139_v2  ;;  %v119_v23 = vpop.permute.xlu2 %118  ;;  %v290_v0 = vpop.permute.xlu0 %289 }
  0xc3   :  { %v142_v33 = vmul.f32 %v1497_v40, %v119_v23 }
  0xc4   :  { %v234_v6 = vadd.f32 %v221_v1, %v155_v4  ;;  %v305_v4 = vmul.f32 %v1509_v44, %v290_v0 }
  0xc5   :  { %v158_v39 = vadd.f32 %v1503_v42, %v142_v33 }
  0xc6   :  { %v313_v7 = vadd.f32 %v300_v5, %v234_v6 }
  0xc7   :  { %v109_v8 = vpop.permute.xlu1 %108  ;;  %v565_v9 = vld [vmem:[#allocation2 + $0x38] sm:$0xff] }
  0xc8   :  { %vm326_vm8 = vcmp.gt.f32.partialorder %v313_v7, 0.0  ;;  %v339_v10 = vmul.f32 0.01, %v313_v7  ;;  %v140_v11 = vmul.f32 %v1497_v40, %v109_v8 }
  0xc9   :  { %1219 = vmatmul.msk.f32.gmra.mxu2 %vm374_vm0, %v565_v9  ;;  %1230 = vmatmul.msk.f32.gmra.mxu3 %vm374_vm0, %v565_v9  ;;  %v691_v9 = vld [vmem:[#allocation2 + $0x70] sm:$0xff] }
  0xca   :  { %v352_v13 = vsel %vm326_vm8, %v313_v7, %v339_v10  ;;  %v156_v14 = vadd.f32 %v1503_v42, %v140_v11  ;;  %v1632_v11 = vld [vmem:[%s1728_s4] ss:$0 sm:$0xff]  ;;  %s1313_s4 = smov 64  }
  0xcb   :  { %1193 = vmatmul.msk.f32.gmra.mxu0 %vm374_vm0, %v352_v13  ;;  %552 = vst.msk [vmem:[#allocation2 + $0x40] sm:$0xff] %vm374_vm0, %v352_v13  ;;  %1206 = vmatmul.msk.f32.gmra.mxu1 %vm374_vm0, %v352_v13  ;;  %v282_v34 = vpop.permute.xlu2 %281  ;;  %v627_v13 = vpop.f32.mrf.mxu2 }
  0xcc   :  { %v235_v18 = vadd.f32 %v222_v15, %v156_v14  ;;  %v303_v41 = vmul.f32 %v1509_v44, %v282_v34 }
  0xd0   :  { %v274_v16 = vpop.permute.xlu1 %273 }
  0xd1   :  { %v301_v19 = vmul.f32 %v1509_v44, %v274_v16 }
  0xd2   :  { %v566_v20 = vld [vmem:[#allocation2 + $0x40] sm:$0xff] }
  0xd3   :  { %v314_v22 = vadd.f32 %v301_v19, %v235_v18  ;;  %1220 = vmatmul.msk.f32.gmra.mxu2 %vm374_vm0, %v566_v20  ;;  %1231 = vmatmul.msk.f32.gmra.mxu3 %vm374_vm0, %v566_v20  ;;  %v286_v50 = vpop.permute.xlu2 %285 }
  0xd4   :  { %v304_v56 = vmul.f32 %v1509_v44, %v286_v50 }
  0xd5   :  { %vm327_vm9 = vcmp.gt.f32.partialorder %v314_v22, 0.0  ;;  %v340_v26 = vmul.f32 0.01, %v314_v22 }
  0xd7   :  { %v353_v27 = vsel %vm327_vm9, %v314_v22, %v340_v26  ;;  %vm845_vm9 = vcmask 1048064  }
  0xd8   :  { %1194 = vmatmul.msk.f32.gmra.mxu0 %vm374_vm0, %v353_v27  ;;  %553 = vst.msk [vmem:[#allocation2 + $0x48] sm:$0xff] %vm374_vm0, %v353_v27  ;;  %1207 = vmatmul.msk.f32.gmra.mxu1 %vm374_vm0, %v353_v27  ;;  %v278_v28 = vpop.permute.xlu1 %277 }
  0xd9   :  { %v302_v30 = vmul.f32 %v1509_v44, %v278_v28 }
  0xdb   :  { %v315_v31 = vadd.f32 %v302_v30, %v236_v29 }
  0xdc   :  { %v211_v60 = vpop.permute.xlu2 %210 }
  0xdd   :  { %vm328_vm10 = vcmp.gt.f32.partialorder %v315_v31, 0.0  ;;  %v341_v32 = vmul.f32 0.01, %v315_v31  ;;  %v226_v2 = vmul.f32 %v1505_v43, %v211_v60 }
  0xdf   :  { %v354_v35 = vsel %vm328_vm10, %v315_v31, %v341_v32  ;;  %v567_v36 = vld [vmem:[#allocation2 + $0x48] sm:$0xff] }
  0xe0   :  { %1195 = vmatmul.msk.f32.gmra.mxu0 %vm374_vm0, %v354_v35  ;;  %554 = vst.msk [vmem:[#allocation2 + $0x50] sm:$0xff] %vm374_vm0, %v354_v35  ;;  %1208 = vmatmul.msk.f32.gmra.mxu1 %vm374_vm0, %v354_v35 }
  0xe1   :  { %1221 = vmatmul.msk.f32.gmra.mxu2 %vm374_vm0, %v567_v36  ;;  %1232 = vmatmul.msk.f32.gmra.mxu3 %vm374_vm0, %v567_v36  ;;  %v203_v37 = vpop.permute.xlu1 %202 }
  0xe2   :  { %v224_v45 = vmul.f32 %v1505_v43, %v203_v37 }
  0xe4   :  { %v237_v46 = vadd.f32 %v224_v45, %v158_v39 }
  0xe6   :  { %v316_v48 = vadd.f32 %v303_v41, %v237_v46 }
  0xe7   :  { %v568_v49 = vld [vmem:[#allocation2 + $0x50] sm:$0xff] }
  0xe8   :  { %vm329_vm11 = vcmp.gt.f32.partialorder %v316_v48, 0.0  ;;  %v342_v52 = vmul.f32 0.01, %v316_v48 }
  0xe9   :  { %1222 = vmatmul.msk.f32.gmra.mxu2 %vm374_vm0, %v568_v49  ;;  %1233 = vmatmul.msk.f32.gmra.mxu3 %vm374_vm0, %v568_v49  ;;  %v207_v53 = vpop.permute.xlu1 %206 }
  0xea   :  { %v225_v54 = vmul.f32 %v1505_v43, %v207_v53  ;;  %v355_v55 = vsel %vm329_vm11, %v316_v48, %v342_v52 }
  0xeb   :  { %1196 = vmatmul.msk.f32.gmra.mxu0 %vm374_vm0, %v355_v55  ;;  %555 = vst.msk [vmem:[#allocation2 + $0x58] sm:$0xff] %vm374_vm0, %v355_v55  ;;  %1209 = vmatmul.msk.f32.gmra.mxu1 %vm374_vm0, %v355_v55 }
  0xec   :  { %v238_v57 = vadd.f32 %v225_v54, %v159_v51 }
  0xee   :  { %v317_v58 = vadd.f32 %v304_v56, %v238_v57 }
  0xf0   :  { %vm330_vm12 = vcmp.gt.f32.partialorder %v317_v58, 0.0  ;;  %v343_v59 = vmul.f32 0.01, %v317_v58 }
  0xf2   :  { %v129_v61 = vpop.permute.xlu1 %128  ;;  %v356_v62 = vsel %vm330_vm12, %v317_v58, %v343_v59  ;;  %v569_v63 = vld [vmem:[#allocation2 + $0x58] sm:$0xff] }
  0xf3   :  { %v144_v1 = vmul.f32 %v1497_v40, %v129_v61  ;;  %1197 = vmatmul.msk.f32.gmra.mxu0 %vm374_vm0, %v356_v62  ;;  %556 = vst.msk [vmem:[#allocation2 + $0x60] sm:$0xff] %vm374_vm0, %v356_v62  ;;  %1210 = vmatmul.msk.f32.gmra.mxu1 %vm374_vm0, %v356_v62 }
  0xf4   :  { %1223 = vmatmul.msk.f32.gmra.mxu2 %vm374_vm0, %v569_v63  ;;  %1234 = vmatmul.msk.f32.gmra.mxu3 %vm374_vm0, %v569_v63 }
  0xf5   :  { %v160_v3 = vadd.f32 %v1503_v42, %v144_v1 }
  0xf7   :  { %v239_v5 = vadd.f32 %v226_v2, %v160_v3 }
  0xf9   :  { %v318_v6 = vadd.f32 %v305_v4, %v239_v5  ;;  %v900_v4 = vld [vmem:[#allocation4 + $0x78] sm:$0xff] }
  0xfa   :  { %v570_v7 = vld [vmem:[#allocation2 + $0x60] sm:$0xff]  ;;  %996 = vmatpush.msrb.mxu0 %v900_v4  ;;  %v908_v4 = vld [vmem:[#allocation4 + $0xb8] sm:$0xff] }
  0xfb   :  { %vm331_vm13 = vcmp.gt.f32.partialorder %v318_v6, 0.0  ;;  %v344_v40 = vmul.f32 0.01, %v318_v6 }
  0xfc   :  { %1224 = vmatmul.msk.f32.gmra.mxu2 %vm374_vm0, %v570_v7  ;;  %1235 = vmatmul.msk.f32.gmra.mxu3 %vm374_vm0, %v570_v7 }
  0xfd   :  { %v357_v8 = vsel %vm331_vm13, %v318_v6, %v344_v40 }
  0xfe   :  { %1198 = vmatmul.msk.f32.gmra.mxu0 %vm374_vm0, %v357_v8  ;;  %557 = vst.msk [vmem:[#allocation2 + $0x68] sm:$0xff] %vm374_vm0, %v357_v8  ;;  %1211 = vmatmul.msk.f32.gmra.mxu1 %vm374_vm0, %v357_v8  ;;  %v899_v8 = vld [vmem:[#allocation4 + $0x70] sm:$0xff] }
  0xff   :  { %997 = vmatpush.msrb.mxu0 %v899_v8 }
 0x105   :  { %v690_v43 = vld [vmem:[#allocation2 + $0x68] sm:$0xff] }
 0x106   :  { %1236 = vmatmul.msk.f32.gmra.mxu3 %vm374_vm0, %v690_v43 }
 0x10b   :  { %v431_v42 = vpop.f32.mrf.mxu0  ;;  %v487_v44 = vpop.f32.mrf.mxu1 }
 0x10c   :  { %v488_v10 = vadd.f32 %v487_v44, %v431_v42  ;;  %v898_v42 = vld [vmem:[#allocation4 + $0x68] sm:$0xff] }
 0x10d   :  { %998 = vmatpush.msrb.mxu0 %v898_v42  ;;  %v906_v42 = vld [vmem:[#allocation4 + $0xa8] sm:$0xff] }
 0x10e   :  { %1237 = vmatmul.msk.f32.gmra.mxu3 %vm374_vm0, %v691_v9  ;;  %v530_v12 = vadd.f32 %v1632_v11, %v488_v10  ;;  %v897_v10 = vld [vmem:[#allocation4 + $0x60] sm:$0xff] }
 0x10f   :  { %999 = vmatpush.msrb.mxu0 %v897_v10  ;;  %v905_v10 = vld [vmem:[#allocation4 + $0xa0] sm:$0xff] }
 0x110   :  { %v666_v14 = vadd.f32 %v627_v13, %v530_v12 }
 0x113   :  { %v434_v15 = vpop.f32.mrf.mxu0  ;;  %v490_v16 = vpop.f32.mrf.mxu1 }
 0x114   :  { %v491_v19 = vadd.f32 %v490_v16, %v434_v15  ;;  %v895_v15 = vld [vmem:[#allocation4 + $0x50] sm:$0xff] }
 0x116   :  { %v531_v23 = vadd.f32 %v1632_v11, %v491_v19  ;;  %v894_v19 = vld [vmem:[#allocation4 + $0x48] sm:$0xff] }
 0x118   :  { %v748_v17 = vpop.f32.mrf.mxu3 }
 0x119   :  { %v787_v18 = vadd.f32 %v748_v17, %v666_v14  ;;  %v896_v14 = vld [vmem:[#allocation4 + $0x58] sm:$0xff] }
 0x11a   :  { %v630_v22 = vpop.f32.mrf.mxu2  ;;  %1000 = vmatpush.msrb.mxu0 %v896_v14  ;;  %v904_v14 = vld [vmem:[#allocation4 + $0x98] sm:$0xff] }
 0x11b   :  { %vm800_vm14 = vcmp.gt.f32.partialorder %v787_v18, 0.0  ;;  %v813_v20 = vmul.f32 0.01, %v787_v18  ;;  %v667_v24 = vadd.f32 %v630_v22, %v531_v23  ;;  %v437_v27 = vpop.f32.mrf.mxu0  ;;  %v493_v29 = vpop.f32.mrf.mxu1  ;;  %v893_v23 = vld [vmem:[#allocation4 + $0x40] sm:$0xff] }
 0x11c   :  { %v494_v31 = vadd.f32 %v493_v29, %v437_v27  ;;  %1001 = vmatpush.msrb.mxu0 %v895_v15  ;;  %v890_v29 = vld [vmem:[#allocation4 + $0x28] sm:$0xff]  ;;  %v931_v15 = vld [vmem:[#allocation4 + $0x170] sm:$0xff] }
 0x11d   :  { %v826_v21 = vsel %vm800_vm14, %v787_v18, %v813_v20  ;;  %vm1179_vm14 = vcmask 31744  }
 0x11e   :  { %840 = vst.msk [vmem:[#allocation3] sm:$0xff] %vm839_vm15, %v826_v21  ;;  %v532_v33 = vadd.f32 %v1632_v11, %v494_v31  ;;  %1002 = vmatpush.msrb.mxu0 %v894_v19  ;;  %v947_v19 = vld [vmem:[#allocation4 + $0x1f0] sm:$0xff] }
 0x120   :  { %v751_v25 = vpop.f32.mrf.mxu3  ;;  %1003 = vmatpush.msrb.mxu0 %v893_v23 }
 0x121   :  { %v788_v26 = vadd.f32 %v751_v25, %v667_v24  ;;  %v892_v25 = vld [vmem:[#allocation4 + $0x38] sm:$0xff] }
 0x122   :  { %v633_v32 = vpop.f32.mrf.mxu2  ;;  %1004 = vmatpush.msrb.mxu0 %v892_v25 }
 0x123   :  { %v814_v28 = vmul.f32 0.01, %v788_v26  ;;  %vm801_vm0 = vcmp.gt.f32.partialorder %v788_v26, 0.0  ;;  %v440_v34 = vpop.f32.mrf.mxu0  ;;  %v496_v35 = vpop.f32.mrf.mxu1  ;;  %v668_v36 = vadd.f32 %v633_v32, %v532_v33 }
 0x124   :  { %v497_v38 = vadd.f32 %v496_v35, %v440_v34  ;;  %v889_v34 = vld [vmem:[#allocation4 + $0x20] sm:$0xff]  ;;  %v888_v35 = vld [vmem:[#allocation4 + $0x18] sm:$0xff] }
 0x125   :  { %v827_v30 = vsel %vm801_vm0, %v788_v26, %v814_v28  ;;  %v891_v28 = vld [vmem:[#allocation4 + $0x30] sm:$0xff] }
 0x126   :  { %842 = vrot.lane.b32.xlu2 %v827_v30, %s1313_s4  ;;  %v533_v46 = vadd.f32 %v1632_v11, %v497_v38  ;;  %1005 = vmatpush.msrb.mxu0 %v891_v28 }
 0x128   :  { %1006 = vmatpush.msrb.mxu0 %v890_v29 }
 0x12a   :  { %v636_v45 = vpop.f32.mrf.mxu2  ;;  %1007 = vmatpush.msrb.mxu0 %v889_v34 }
 0x12b   :  { %v669_v48 = vadd.f32 %v636_v45, %v533_v46  ;;  %v443_v49 = vpop.f32.mrf.mxu0  ;;  %v499_v50 = vpop.f32.mrf.mxu1  ;;  %v915_v45 = vld [vmem:[#allocation4 + $0xf0] sm:$0xff] }
 0x12c   :  { %v500_v54 = vadd.f32 %v499_v50, %v443_v49  ;;  %1008 = vmatpush.msrb.mxu0 %v888_v35  ;;  %v885_v49 = vld [vmem:[#allocation4] sm:$0xff] }
 0x12d   :  { %v913_v50 = vld [vmem:[#allocation4 + $0xe0] sm:$0xff] }
 0x12e   :  { %v534_v59 = vadd.f32 %v1632_v11, %v500_v54  ;;  %v945_v35 = vld [vmem:[#allocation4 + $0x1e0] sm:$0xff] }
 0x130   :  { %v754_v37 = vpop.f32.mrf.mxu3 }
 0x131   :  { %v789_v39 = vadd.f32 %v754_v37, %v668_v36  ;;  %v916_v36 = vld [vmem:[#allocation4 + $0xf8] sm:$0xff] }
 0x132   :  { %v639_v56 = vpop.f32.mrf.mxu2  ;;  %1016 = vmatpush.msrb.mxu1 %v916_v36 }
 0x133   :  { %vm802_vm1 = vcmp.gt.f32.partialorder %v789_v39, 0.0  ;;  %v815_v41 = vmul.f32 0.01, %v789_v39  ;;  %v670_v60 = vadd.f32 %v639_v56, %v534_v59 }
 0x134   :  { %1017 = vmatpush.msrb.mxu1 %v915_v45 }
 0x135   :  { %v828_v47 = vsel %vm802_vm1, %v789_v39, %v815_v41  ;;  %v446_v57 = vpop.f32.mrf.mxu0  ;;  %v502_v58 = vpop.f32.mrf.mxu1  ;;  %v887_v41 = vld [vmem:[#allocation4 + $0x10] sm:$0xff] }
 0x136   :  { %847 = vst.msk [vmem:[#allocation3 + $0x8] sm:$0xff] %vm839_vm15, %v828_v47  ;;  %v503_v61 = vadd.f32 %v502_v58, %v446_v57  ;;  %1009 = vmatpush.msrb.mxu0 %v887_v41  ;;  %v886_v47 = vld [vmem:[#allocation4 + $0x8] sm:$0xff] }
 0x138   :  { %v757_v51 = vpop.f32.mrf.mxu3  ;;  %v535_v0 = vadd.f32 %v1632_v11, %v503_v61  ;;  %1010 = vmatpush.msrb.mxu0 %v886_v47  ;;  %v910_v61 = vld [vmem:[#allocation4 + $0xc8] sm:$0xff]  ;;  %v943_v47 = vld [vmem:[#allocation4 + $0x1d0] sm:$0xff] }
 0x139   :  { %v790_v52 = vadd.f32 %v757_v51, %v669_v48  ;;  %v914_v48 = vld [vmem:[#allocation4 + $0xe8] sm:$0xff] }
 0x13a   :  { %v642_v2 = vpop.f32.mrf.mxu2  ;;  %1018 = vmatpush.msrb.mxu1 %v914_v48  ;;  %1011 = vmatpush.msrb.mxu0 %v885_v49  ;;  %v926_v49 = vld [vmem:[#allocation4 + $0x148] sm:$0xff] }
 0x13b   :  { %v816_v53 = vmul.f32 0.01, %v790_v52  ;;  %vm803_vm2 = vcmp.gt.f32.partialorder %v790_v52, 0.0  ;;  %v671_v5 = vadd.f32 %v642_v2, %v535_v0  ;;  %v909_v0 = vld [vmem:[#allocation4 + $0xc0] sm:$0xff] }
 0x13c   :  { %1019 = vmatpush.msrb.mxu1 %v913_v50  ;;  %v942_v50 = vld [vmem:[#allocation4 + $0x1c8] sm:$0xff] }
 0x13d   :  { %v829_v55 = vsel %vm803_vm2, %v790_v52, %v816_v53  ;;  %v449_v6 = vpop.f32.mrf.mxu0  ;;  %v505_v7 = vpop.f32.mrf.mxu1 }
 0x13e   :  { %849 = vrot.lane.b32.xlu2 %v829_v55, %s1313_s4  ;;  %v506_v44 = vadd.f32 %v505_v7, %v449_v6  ;;  %v912_v55 = vld [vmem:[#allocation4 + $0xd8] sm:$0xff] }
 0x13f   :  { %1020 = vmatpush.msrb.mxu1 %v912_v55  ;;  %v925_v55 = vld [vmem:[#allocation4 + $0x140] sm:$0xff] }
 0x140   :  { %v536_v16 = vadd.f32 %v1632_v11, %v506_v44 }
 0x144   :  { %v760_v62 = vpop.f32.mrf.mxu3  ;;  %v645_v13 = vpop.f32.mrf.mxu2 }
 0x145   :  { %v791_v63 = vadd.f32 %v760_v62, %v670_v60  ;;  %v672_v17 = vadd.f32 %v645_v13, %v536_v16  ;;  %v911_v60 = vld [vmem:[#allocation4 + $0xd0] sm:$0xff] }
 0x146   :  { %1021 = vmatpush.msrb.mxu1 %v911_v60 }
 0x147   :  { %vm804_vm3 = vcmp.gt.f32.partialorder %v791_v63, 0.0  ;;  %v817_v1 = vmul.f32 0.01, %v791_v63 }
 0x148   :  { %v452_v21 = vpop.f32.mrf.mxu0  ;;  %v508_v22 = vpop.f32.mrf.mxu1  ;;  %1022 = vmatpush.msrb.mxu1 %v910_v61  ;;  %v923_v61 = vld [vmem:[#allocation4 + $0x130] sm:$0xff] }
 0x149   :  { %v830_v3 = vsel %vm804_vm3, %v791_v63, %v817_v1  ;;  %v509_v26 = vadd.f32 %v508_v22, %v452_v21  ;;  %v902_v22 = vld [vmem:[#allocation4 + $0x88] sm:$0xff] }
 0x14a   :  { %853 = vst.msk [vmem:[#allocation3 + $0x10] sm:$0xff] %vm839_vm15, %v830_v3  ;;  %1023 = vmatpush.msrb.mxu1 %v909_v0 }
 0x14b   :  { %v537_v30 = vadd.f32 %v1632_v11, %v509_v26  ;;  %v901_v26 = vld [vmem:[#allocation4 + $0x80] sm:$0xff] }
 0x14c   :  { %v763_v40 = vpop.f32.mrf.mxu3  ;;  %v648_v31 = vpop.f32.mrf.mxu2  ;;  %1024 = vmatpush.msrb.mxu1 %v908_v4  ;;  %v920_v4 = vld [vmem:[#allocation4 + $0x118] sm:$0xff] }
 0x14d   :  { %v792_v43 = vadd.f32 %v763_v40, %v671_v5  ;;  %v673_v37 = vadd.f32 %v648_v31, %v537_v30  ;;  %v907_v40 = vld [vmem:[#allocation4 + $0xb0] sm:$0xff]  ;;  %v930_v30 = vld [vmem:[#allocation4 + $0x168] sm:$0xff] }
 0x14e   :  { %1025 = vmatpush.msrb.mxu1 %v907_v40  ;;  %v946_v31 = vld [vmem:[#allocation4 + $0x1e8] sm:$0xff] }
 0x14f   :  { %v818_v9 = vmul.f32 0.01, %v792_v43  ;;  %vm805_vm4 = vcmp.gt.f32.partialorder %v792_v43, 0.0 }
 0x150   :  { %1026 = vmatpush.msrb.mxu1 %v906_v42  ;;  %v988_v42 = vld [vmem:[#allocation4 + $0x338] sm:$0xff] }
 0x151   :  { %v831_v12 = vsel %vm805_vm4, %v792_v43, %v818_v9  ;;  %v932_v9 = vld [vmem:[#allocation4 + $0x178] sm:$0xff] }
 0x152   :  { %855 = vrot.lane.b32.xlu1 %v831_v12, %s1313_s4  ;;  %v948_v12 = vld [vmem:[#allocation4 + $0x1f8] sm:$0xff]  ;;  %1036 = vmatpush.msrb.mxu2 %v932_v9  ;;  %v987_v9 = vld [vmem:[#allocation4 + $0x330] sm:$0xff] }
 0x153   :  { %1056 = vmatpush.msrb.mxu3 %v948_v12  ;;  %1027 = vmatpush.msrb.mxu1 %v905_v10  ;;  %v986_v10 = vld [vmem:[#allocation4 + $0x328] sm:$0xff]  ;;  %v985_v12 = vld [vmem:[#allocation4 + $0x320] sm:$0xff] }
 0x154   :  { %1037 = vmatpush.msrb.mxu2 %v931_v15  ;;  %v983_v15 = vld [vmem:[#allocation4 + $0x310] sm:$0xff] }
 0x155   :  { %v455_v32 = vpop.f32.mrf.mxu0  ;;  %v511_v33 = vpop.f32.mrf.mxu1  ;;  %1028 = vmatpush.msrb.mxu1 %v904_v14  ;;  %1057 = vmatpush.msrb.mxu3 %v947_v19  ;;  %v984_v14 = vld [vmem:[#allocation4 + $0x318] sm:$0xff] }
 0x156   :  { %v766_v18 = vpop.f32.mrf.mxu3  ;;  %v512_v38 = vadd.f32 %v511_v33, %v455_v32  ;;  %v651_v53 = vpop.f32.mrf.mxu2  ;;  %v929_v32 = vld [vmem:[#allocation4 + $0x160] sm:$0xff]  ;;  %1038 = vmatpush.msrb.mxu2 %v930_v30  ;;  %v964_v19 = vld [vmem:[#allocation4 + $0x278] sm:$0xff] }
 0x157   :  { %v793_v20 = vadd.f32 %v766_v18, %v672_v17  ;;  %v903_v18 = vld [vmem:[#allocation4 + $0x90] sm:$0xff]  ;;  %1058 = vmatpush.msrb.mxu3 %v946_v31  ;;  %1076 = vmatpush.msra.mxu0 %v964_v19  ;;  %v933_v30 = vld [vmem:[#allocation4 + $0x180] sm:$0xff] }
 0x158   :  { %v538_v51 = vadd.f32 %v1632_v11, %v512_v38  ;;  %1029 = vmatpush.msrb.mxu1 %v903_v18  ;;  %v944_v38 = vld [vmem:[#allocation4 + $0x1d8] sm:$0xff]  ;;  %1039 = vmatpush.msrb.mxu2 %v929_v32  ;;  %v981_v18 = vld [vmem:[#allocation4 + $0x300] sm:$0xff]  ;;  %v958_v32 = vld [vmem:[#allocation4 + $0x248] sm:$0xff] }
 0x159   :  { %vm806_vm5 = vcmp.gt.f32.partialorder %v793_v20, 0.0  ;;  %v819_v24 = vmul.f32 0.01, %v793_v20  ;;  %1059 = vmatpush.msrb.mxu3 %v945_v35  ;;  %v980_v35 = vld [vmem:[#allocation4 + $0x2f8] sm:$0xff] }
 0x15a   :  { %v674_v56 = vadd.f32 %v651_v53, %v538_v51  ;;  %1030 = vmatpush.msrb.mxu1 %v902_v22  ;;  %v937_v22 = vld [vmem:[#allocation4 + $0x1a0] sm:$0xff] }
 0x15b   :  { %v832_v27 = vsel %vm806_vm5, %v793_v20, %v819_v24  ;;  %1060 = vmatpush.msrb.mxu3 %v944_v38  ;;  %v954_v38 = vld [vmem:[#allocation4 + $0x228] sm:$0xff] }
 0x15c   :  { %859 = vst.msk [vmem:[#allocation3 + $0x18] sm:$0xff] %vm839_vm15, %v832_v27  ;;  %1031 = vmatpush.msrb.mxu1 %v901_v26  ;;  %v935_v26 = vld [vmem:[#allocation4 + $0x190] sm:$0xff] }
 0x15d   :  { %v458_v57 = vpop.f32.mrf.mxu0  ;;  %v514_v58 = vpop.f32.mrf.mxu1  ;;  %1061 = vmatpush.msrb.mxu3 %v943_v47  ;;  %v977_v47 = vld [vmem:[#allocation4 + $0x2e0] sm:$0xff] }
 0x15e   :  { %v515_v1 = vadd.f32 %v514_v58, %v458_v57  ;;  %v924_v57 = vld [vmem:[#allocation4 + $0x138] sm:$0xff]  ;;  %1096 = vmatpush.msra.mxu1 %v980_v35  ;;  %v1279_v35 = vld [vmem:[%s1733_s9] ss:$0 sm:$0xff] }
 0x15f   :  { %1062 = vmatpush.msrb.mxu3 %v942_v50  ;;  %v950_v50 = vld [vmem:[#allocation4 + $0x208] sm:$0xff] }
 0x160   :  { %v539_v7 = vadd.f32 %v1632_v11, %v515_v1 }
 0x164   :  { %v769_v39 = vpop.f32.mrf.mxu3  ;;  %v654_v2 = vpop.f32.mrf.mxu2 }
 0x165   :  { %v794_v46 = vadd.f32 %v769_v39, %v673_v37  ;;  %v675_v8 = vadd.f32 %v654_v2, %v539_v7  ;;  %v928_v37 = vld [vmem:[#allocation4 + $0x158] sm:$0xff]  ;;  %v921_v2 = vld [vmem:[#allocation4 + $0x120] sm:$0xff]  ;;  %v918_v7 = vld [vmem:[#allocation4 + $0x108] sm:$0xff] }
 0x166   :  { %1040 = vmatpush.msrb.mxu2 %v928_v37  ;;  %v955_v37 = vld [vmem:[#allocation4 + $0x230] sm:$0xff] }
 0x167   :  { %v820_v52 = vmul.f32 0.01, %v794_v46  ;;  %vm807_vm6 = vcmp.gt.f32.partialorder %v794_v46, 0.0 }
 0x168   :  { %v461_v5 = vpop.f32.mrf.mxu0  ;;  %v517_v6 = vpop.f32.mrf.mxu1 }
 0x169   :  { %v833_v54 = vsel %vm807_vm6, %v794_v46, %v820_v52  ;;  %v518_v43 = vadd.f32 %v517_v6, %v461_v5  ;;  %v927_v46 = vld [vmem:[#allocation4 + $0x150] sm:$0xff] }
 0x16a   :  { %861 = vrot.lane.b32.xlu1 %v833_v54, %s1313_s4  ;;  %1041 = vmatpush.msrb.mxu2 %v927_v46  ;;  %v952_v46 = vld [vmem:[#allocation4 + $0x218] sm:$0xff] }
 0x16b   :  { %v540_v16 = vadd.f32 %v1632_v11, %v518_v43  ;;  %v917_v43 = vld [vmem:[#allocation4 + $0x100] sm:$0xff] }
 0x16c   :  { %v772_v59 = vpop.f32.mrf.mxu3  ;;  %v657_v20 = vpop.f32.mrf.mxu2  ;;  %1042 = vmatpush.msrb.mxu2 %v926_v49  ;;  %v976_v49 = vld [vmem:[#allocation4 + $0x2d8] sm:$0xff] }
 0x16d   :  { %v795_v62 = vadd.f32 %v772_v59, %v674_v56  ;;  %v676_v25 = vadd.f32 %v657_v20, %v540_v16  ;;  %v939_v16 = vld [vmem:[#allocation4 + $0x1b0] sm:$0xff]  ;;  %v938_v20 = vld [vmem:[#allocation4 + $0x1a8] sm:$0xff] }
 0x16e   :  { %1043 = vmatpush.msrb.mxu2 %v925_v55  ;;  %v973_v55 = vld [vmem:[#allocation4 + $0x2c0] sm:$0xff] }
 0x16f   :  { %vm808_vm7 = vcmp.gt.f32.partialorder %v795_v62, 0.0  ;;  %v821_v63 = vmul.f32 0.01, %v795_v62 }
 0x170   :  { %v464_v23 = vpop.f32.mrf.mxu0  ;;  %v520_v24 = vpop.f32.mrf.mxu1  ;;  %1044 = vmatpush.msrb.mxu2 %v924_v57  ;;  %v971_v57 = vld [vmem:[#allocation4 + $0x2b0] sm:$0xff] }
 0x171   :  { %v834_v3 = vsel %vm808_vm7, %v795_v62, %v821_v63  ;;  %v521_v33 = vadd.f32 %v520_v24, %v464_v23  ;;  %v922_v63 = vld [vmem:[#allocation4 + $0x128] sm:$0xff]  ;;  %v936_v24 = vld [vmem:[#allocation4 + $0x198] sm:$0xff] }
 0x172   :  { %865 = vst.msk [vmem:[#allocation3 + $0x20] sm:$0xff] %vm839_vm15, %v834_v3  ;;  %1045 = vmatpush.msrb.mxu2 %v923_v61  ;;  %v962_v23 = vld [vmem:[#allocation4 + $0x268] sm:$0xff]  ;;  %v968_v61 = vld [vmem:[#allocation4 + $0x298] sm:$0xff] }
 0x173   :  { %v541_v48 = vadd.f32 %v1632_v11, %v521_v33  ;;  %v957_v33 = vld [vmem:[#allocation4 + $0x240] sm:$0xff] }
 0x174   :  { %1046 = vmatpush.msrb.mxu2 %v922_v63 }
 0x176   :  { %1047 = vmatpush.msrb.mxu2 %v921_v2 }
 0x177   :  { %v775_v44 = vpop.f32.mrf.mxu3  ;;  %v660_v36 = vpop.f32.mrf.mxu2 }
 0x178   :  { %v796_v13 = vadd.f32 %v775_v44, %v675_v8  ;;  %v677_v51 = vadd.f32 %v660_v36, %v541_v48  ;;  %1048 = vmatpush.msrb.mxu2 %v920_v4  ;;  %v941_v44 = vld [vmem:[#allocation4 + $0x1c0] sm:$0xff]  ;;  %v979_v36 = vld [vmem:[#allocation4 + $0x2f0] sm:$0xff] }
 0x179   :  { %1063 = vmatpush.msrb.mxu3 %v941_v44  ;;  %1097 = vmatpush.msra.mxu1 %v979_v36  ;;  %v951_v48 = vld [vmem:[#allocation4 + $0x210] sm:$0xff] }
 0x17a   :  { %v822_v17 = vmul.f32 0.01, %v796_v13  ;;  %vm809_vm8 = vcmp.gt.f32.partialorder %v796_v13, 0.0  ;;  %v1147_v44 = vld [vmem:[%s1732_s8 + $0x40] sm:$0xff] }
 0x17b   :  { %v467_v41 = vpop.f32.mrf.mxu0  ;;  %v523_v45 = vpop.f32.mrf.mxu1 }
 0x17c   :  { %v835_v21 = vsel %vm809_vm8, %v796_v13, %v822_v17  ;;  %v524_v52 = vadd.f32 %v523_v45, %v467_v41  ;;  %v940_v13 = vld [vmem:[#allocation4 + $0x1b8] sm:$0xff]  ;;  %v982_v17 = vld [vmem:[#allocation4 + $0x308] sm:$0xff]  ;;  %v953_v41 = vld [vmem:[#allocation4 + $0x220] sm:$0xff] }
 0x17d   :  { %867 = vrot.lane.b32.xlu0 %v835_v21, %s1313_s4  ;;  %1064 = vmatpush.msrb.mxu3 %v940_v13  ;;  %v963_v21 = vld [vmem:[#allocation4 + $0x270] sm:$0xff]  ;;  %v978_v45 = vld [vmem:[#allocation4 + $0x2e8] sm:$0xff] }
 0x17e   :  { %v542_v58 = vadd.f32 %v1632_v11, %v524_v52  ;;  %v919_v11 = vld [vmem:[#allocation4 + $0x110] sm:$0xff]  ;;  %1077 = vmatpush.msra.mxu0 %v963_v21  ;;  %1098 = vmatpush.msra.mxu1 %v978_v45 }
 0x17f   :  { %v778_v27 = vpop.f32.mrf.mxu3  ;;  %v663_v60 = vpop.f32.mrf.mxu2  ;;  %1049 = vmatpush.msrb.mxu2 %v919_v11  ;;  %1065 = vmatpush.msrb.mxu3 %v939_v16  ;;  %v1154_v11 = vld [vmem:[%s1732_s8 + $0x78] sm:$0xff]  ;;  %v1143_v13 = vld [vmem:[%s1732_s8 + $0x20] sm:$0xff]  ;;  %v1140_v16 = vld [vmem:[%s1732_s8 + $0x8] sm:$0xff] }
 0x180   :  { %v797_v28 = vadd.f32 %v778_v27, %v676_v25  ;;  %v843_v29 = vpop.permute.xlu2 %842  ;;  %v678_v0 = vadd.f32 %v663_v60, %v542_v58  ;;  %1078 = vmatpush.msra.mxu0 %v962_v23  ;;  %v961_v25 = vld [vmem:[#allocation4 + $0x260] sm:$0xff]  ;;  %v960_v27 = vld [vmem:[#allocation4 + $0x258] sm:$0xff]  ;;  %1099 = vmatpush.msra.mxu1 %v977_v47 }
 0x181   :  { %846 = vst.msk [vmem:[#allocation3] sm:$0xff] %vm845_vm9, %v843_v29  ;;  %1050 = vmatpush.msrb.mxu2 %v918_v7  ;;  %1066 = vmatpush.msrb.mxu3 %v938_v20  ;;  %v959_v29 = vld [vmem:[#allocation4 + $0x250] sm:$0xff]  ;;  %v969_v60 = vld [vmem:[#allocation4 + $0x2a0] sm:$0xff]  ;;  %v1152_v7 = vld [vmem:[%s1732_s8 + $0x68] sm:$0xff] }
 0x182   :  { %vm810_vm10 = vcmp.gt.f32.partialorder %v797_v28, 0.0  ;;  %v823_v34 = vmul.f32 0.01, %v797_v28  ;;  %1079 = vmatpush.msra.mxu0 %v961_v25  ;;  %1100 = vmatpush.msra.mxu1 %v976_v49 }
 0x183   :  { %1051 = vmatpush.msrb.mxu2 %v917_v43  ;;  %1067 = vmatpush.msrb.mxu3 %v937_v22  ;;  %v1149_v43 = vld [vmem:[%s1732_s8 + $0x50] sm:$0xff] }
 0x184   :  { %v836_v39 = vsel %vm810_vm10, %v797_v28, %v823_v34  ;;  %v934_v28 = vld [vmem:[#allocation4 + $0x188] sm:$0xff]  ;;  %1080 = vmatpush.msra.mxu0 %v960_v27  ;;  %v956_v34 = vld [vmem:[#allocation4 + $0x238] sm:$0xff] }
 0x185   :  { %871 = vst.msk [vmem:[#allocation3 + $0x28] sm:$0xff] %vm839_vm15, %v836_v39  ;;  %1124 = vmatpush.msra.mxu2 %v988_v42  ;;  %1068 = vmatpush.msrb.mxu3 %v936_v24  ;;  %v1148_v42 = vld [vmem:[%s1732_s8 + $0x48] sm:$0xff] }
 0x186   :  { %1081 = vmatpush.msra.mxu0 %v959_v29 }
 0x187   :  { %1125 = vmatpush.msra.mxu2 %v987_v9  ;;  %1069 = vmatpush.msrb.mxu3 %v935_v26  ;;  %v1146_v9 = vld [vmem:[%s1732_s8 + $0x38] sm:$0xff] }
 0x188   :  { %v878_v53 = vld [vmem:[#allocation3] sm:$0xff]  ;;  %1082 = vmatpush.msra.mxu0 %v958_v32 }
 0x189   :  { %v781_v54 = vpop.f32.mrf.mxu3  ;;  %1012 = vmatmul.f32.vlgmr.msrb.gmra.mxu0 %v878_v53  ;;  %1126 = vmatpush.msra.mxu2 %v986_v10  ;;  %v949_v53 = vld [vmem:[#allocation4 + $0x200] sm:$0xff] }
 0x18a   :  { %v798_v56 = vadd.f32 %v781_v54, %v677_v51  ;;  %1070 = vmatpush.msrb.mxu3 %v934_v28  ;;  %1083 = vmatpush.msra.mxu0 %v957_v33  ;;  %v975_v51 = vld [vmem:[#allocation4 + $0x2d0] sm:$0xff]  ;;  %v974_v54 = vld [vmem:[#allocation4 + $0x2c8] sm:$0xff]  ;;  %v1145_v10 = vld [vmem:[%s1732_s8 + $0x30] sm:$0xff] }
 0x18b   :  { %1127 = vmatpush.msra.mxu2 %v985_v12  ;;  %1101 = vmatpush.msra.mxu1 %v975_v51  ;;  %v1144_v12 = vld [vmem:[%s1732_s8 + $0x28] sm:$0xff] }
 0x18c   :  { %v824_v59 = vmul.f32 0.01, %v798_v56  ;;  %vm811_vm11 = vcmp.gt.f32.partialorder %v798_v56, 0.0  ;;  %1071 = vmatpush.msrb.mxu3 %v933_v30  ;;  %1084 = vmatpush.msra.mxu0 %v956_v34 }
 0x18d   :  { %1128 = vmatpush.msra.mxu2 %v984_v14  ;;  %1102 = vmatpush.msra.mxu1 %v974_v54  ;;  %v1142_v14 = vld [vmem:[%s1732_s8 + $0x18] sm:$0xff] }
 0x18e   :  { %v837_v62 = vsel %vm811_vm11, %v798_v56, %v824_v59  ;;  %1085 = vmatpush.msra.mxu0 %v955_v37  ;;  %v972_v56 = vld [vmem:[#allocation4 + $0x2b8] sm:$0xff]  ;;  %v970_v59 = vld [vmem:[#allocation4 + $0x2a8] sm:$0xff]  ;;  %1159 = vmatpush.msra.mxu3 %v1154_v11 }
 0x18f   :  { %873 = vrot.lane.b32.xlu1 %v837_v62, %s1313_s4  ;;  %1129 = vmatpush.msra.mxu2 %v983_v15  ;;  %v967_v62 = vld [vmem:[#allocation4 + $0x290] sm:$0xff]  ;;  %v1141_v15 = vld [vmem:[%s1732_s8 + $0x10] sm:$0xff] }
 0x190   :  { %1086 = vmatpush.msra.mxu0 %v954_v38  ;;  %1103 = vmatpush.msra.mxu1 %v973_v55 }
 0x191   :  { %v784_v1 = vpop.f32.mrf.mxu3  ;;  %1130 = vmatpush.msra.mxu2 %v982_v17  ;;  %v1139_v17 = vld [vmem:[%s1732_s8] sm:$0xff] }
 0x192   :  { %v799_v3 = vadd.f32 %v784_v1, %v678_v0  ;;  %1087 = vmatpush.msra.mxu0 %v953_v41  ;;  %1104 = vmatpush.msra.mxu1 %v972_v56  ;;  %v966_v0 = vld [vmem:[#allocation4 + $0x288] sm:$0xff]  ;;  %v965_v1 = vld [vmem:[#allocation4 + $0x280] sm:$0xff] }
 0x193   :  { %1131 = vmatpush.msra.mxu2 %v981_v18  ;;  %v1278_v18 = vld [vmem:[%s1731_s7] ss:$0 sm:$0xff] }
 0x194   :  { %vm812_vm12 = vcmp.gt.f32.partialorder %v799_v3, 0.0  ;;  %v825_v5 = vmul.f32 0.01, %v799_v3  ;;  %1088 = vmatpush.msra.mxu0 %v952_v46  ;;  %1105 = vmatpush.msra.mxu1 %v971_v57 }
 0x196   :  { %v838_v6 = vsel %vm812_vm12, %v799_v3, %v825_v5  ;;  %1089 = vmatpush.msra.mxu0 %v951_v48  ;;  %1106 = vmatpush.msra.mxu1 %v970_v59 }
 0x197   :  { %877 = vst.msk [vmem:[#allocation3 + $0x30] sm:$0xff] %vm839_vm15, %v838_v6  ;;  %v1153_v6 = vld [vmem:[%s1732_s8 + $0x70] sm:$0xff] }
 0x198   :  { %v850_v40 = vpop.permute.xlu2 %849  ;;  %1090 = vmatpush.msra.mxu0 %v950_v50  ;;  %1107 = vmatpush.msra.mxu1 %v969_v60 }
 0x199   :  { %852 = vst.msk [vmem:[#allocation3 + $0x8] sm:$0xff] %vm845_vm9, %v850_v40  ;;  %1160 = vmatpush.msra.mxu3 %v1153_v6  ;;  %v1151_v40 = vld [vmem:[%s1732_s8 + $0x60] sm:$0xff] }
 0x19a   :  { %1091 = vmatpush.msra.mxu0 %v949_v53  ;;  %1108 = vmatpush.msra.mxu1 %v968_v61 }
 0x19b   :  { %1161 = vmatpush.msra.mxu3 %v1152_v7 }
 0x19c   :  { %1109 = vmatpush.msra.mxu1 %v967_v62 }
 0x19d   :  { %1162 = vmatpush.msra.mxu3 %v1151_v40 }
 0x19e   :  { %v884_v52 = vld [vmem:[#allocation3 + $0x30] sm:$0xff]  ;;  %1110 = vmatpush.msra.mxu1 %v966_v0 }
 0x1a0   :  { %v879_v8 = vld [vmem:[#allocation3 + $0x8] sm:$0xff]  ;;  %1111 = vmatpush.msra.mxu1 %v965_v1 }
 0x1a1   :  { %1032 = vmatmul.f32.vlgmr.msrb.gmra.mxu1 %v879_v8  ;;  %v1150_v8 = vld [vmem:[%s1732_s8 + $0x58] sm:$0xff] }
 0x1a2   :  { %1163 = vmatpush.msra.mxu3 %v1150_v8 }
 0x1a4   :  { %1164 = vmatpush.msra.mxu3 %v1149_v43 }
 0x1a6   :  { %1165 = vmatpush.msra.mxu3 %v1148_v42 }
 0x1a8   :  { %1166 = vmatpush.msra.mxu3 %v1147_v44 }
 0x1aa   :  { %1167 = vmatpush.msra.mxu3 %v1146_v9 }
 0x1ac   :  { %1168 = vmatpush.msra.mxu3 %v1145_v10 }
 0x1ae   :  { %1169 = vmatpush.msra.mxu3 %v1144_v12 }
 0x1b0   :  { %1170 = vmatpush.msra.mxu3 %v1143_v13 }
 0x1b2   :  { %1171 = vmatpush.msra.mxu3 %v1142_v14 }
 0x1b4   :  { %1172 = vmatpush.msra.mxu3 %v1141_v15 }
 0x1b6   :  { %1173 = vmatpush.msra.mxu3 %v1140_v16 }
 0x1b8   :  { %1174 = vmatpush.msra.mxu3 %v1139_v17 }
 0x1c4   :  { %v856_v31 = vpop.permute.xlu1 %855 }
 0x1c5   :  { %858 = vst.msk [vmem:[#allocation3 + $0x10] sm:$0xff] %vm845_vm9, %v856_v31 }
 0x1cc   :  { %v880_v39 = vld [vmem:[#allocation3 + $0x10] sm:$0xff] }
 0x1cd   :  { %1052 = vmatmul.f32.vlgmr.msrb.gmra.mxu2 %v880_v39 }
 0x1d5   :  { %1238 = vmatmul.msk.f32.vlgmr.msra.gmra.mxu2 %vm839_vm15, %v884_v52 }
 0x1dc   :  { %v862_v58 = vpop.permute.xlu1 %861 }
 0x1dd   :  { %864 = vst.msk [vmem:[#allocation3 + $0x18] sm:$0xff] %vm845_vm9, %v862_v58 }
 0x1e4   :  { %v881_v63 = vld [vmem:[#allocation3 + $0x18] sm:$0xff] }
 0x1e5   :  { %1072 = vmatmul.f32.vlgmr.msrb.gmra.mxu3 %v881_v63 }
 0x1ef   :  { %v868_v2 = vpop.permute.xlu0 %867 }
 0x1f0   :  { %870 = vst.msk [vmem:[#allocation3 + $0x20] sm:$0xff] %vm845_vm9, %v868_v2 }
 0x1f7   :  { %v882_v3 = vld [vmem:[#allocation3 + $0x20] sm:$0xff] }
 0x1f8   :  { %1092 = vmatmul.f32.vlgmr.msra.gmra.mxu0 %v882_v3 }
 0x201   :  { %v874_v4 = vpop.permute.xlu1 %873 }
 0x202   :  { %876 = vst.msk [vmem:[#allocation3 + $0x28] sm:$0xff] %vm845_vm9, %v874_v4 }
 0x206   :  { %v1013_v19 = vpop.f32.mrf.mxu0 }
 0x207   :  { %v1014_v21 = vadd.f32 %v1278_v18, %v1013_v19 }
 0x209   :  { %v883_v5 = vld [vmem:[#allocation3 + $0x28] sm:$0xff] }
 0x20a   :  { %1112 = vmatmul.f32.vlgmr.msra.gmra.mxu1 %v883_v5 }
 0x21e   :  { %v1033_v20 = vpop.f32.mrf.mxu1 }
 0x21f   :  { %v1034_v23 = vadd.f32 %v1033_v20, %v1014_v21 }
 0x250   :  { %v1053_v22 = vpop.f32.mrf.mxu2 }
 0x251   :  { %v1054_v25 = vadd.f32 %v1053_v22, %v1034_v23 }
 0x258   :  { %v1133_v31 = vpop.f32.mrf.mxu2 }
 0x268   :  { %v1073_v24 = vpop.f32.mrf.mxu3 }
 0x269   :  { %v1074_v27 = vadd.f32 %v1073_v24, %v1054_v25 }
 0x275   :  { %v1093_v26 = vpop.f32.mrf.mxu0 }
 0x276   :  { %v1094_v28 = vadd.f32 %v1093_v26, %v1074_v27 }
 0x287   :  { %v1113_v29 = vpop.f32.mrf.mxu1 }
 0x288   :  { %v1114_v30 = vadd.f32 %v1113_v29, %v1094_v28 }
 0x28a   :  { %v1134_v32 = vadd.f32 %v1133_v31, %v1114_v30 }
 0x28c   :  { %v1137_v33 = vmul.f32 0.01, %v1134_v32  ;;  %vm1136_vm13 = vcmp.gt.f32.partialorder %v1134_v32, 0.0 }
 0x28e   :  { %v1138_v34 = vsel %vm1136_vm13, %v1134_v32, %v1137_v33 }
 0x28f   :  { %1175 = vmatmul.f32.vlgmr.msra.gmra.mxu3 %v1138_v34 }
 0x312   :  { %v1176_v36 = vpop.f32.mrf.mxu3 }
 0x313   :  { %v1177_v37 = vadd.f32 %v1279_v35, %v1176_v36 }
 0x315   :  { %1180 = vst.msk [vmem:[%s1734_s10] sm:$0xff] %vm1179_vm14, %v1177_v37 }
 0x316   :  { %1185 = vsyncpa [#allocation5], 1 }

</bundles_post_ra>
